<compile_context>
chip_gen: v5e
topology: v5e:2x2
jax: 0.10.0
libtpu: 0.0.40
codegen_flags: <defaults>
</compile_context>

<pallas_src>
import functools

import jax
import jax.numpy as jnp
from jax.experimental import pallas as pl
from jax.experimental.pallas import tpu as pltpu


def bottleneck_kernel(x_ref, xh_ref, w1_ref, s1_ref, b1_ref,
                      w2_ref, s2_ref, b2_ref, w3_ref, s3_ref, b3_ref,
                      o_ref, halo_ref, sem, *, w_real, has_halo):
    """One (image n, row-tile t) grid step.

    x_ref  : (1, TH, Wp, Cin)       auto-pipelined NHWC row tile (io dtype)
    xh_ref : (N, H, Wp, Cin)        same tensor, raw HBM ref (halo DMA source)
    w1_ref : (Cin, P)     bf16      w2_ref : (3, 3P, P) bf16 ((kw,cin) flattened)
    w3_ref : (P, Cout)    bf16      s*/b*  : (1, C) f32 folded BN scale/bias
    o_ref  : (1, TH, Wp, Cout)
    halo_ref: VMEM (2, Wp, Cin) scratch,  sem: 2 DMA semaphores
    w_real : real (unpadded) image width; has_halo: static, nt > 1
    """
    n = pl.program_id(0)
    t = pl.program_id(1)
    nt = pl.num_programs(1)
    TH, Wp, Cin = x_ref.shape[1], x_ref.shape[2], x_ref.shape[3]
    H = xh_ref.shape[1]
    P = w1_ref.shape[1]
    Cout = w3_ref.shape[1]
    M = TH * Wp
    R = (TH + 2) * Wp

    # ---- halo DMA (rows t*TH-1 and t*TH+TH, clamped); skipped statically when
    #      the whole H fits one tile (both halos are the zero-pad case). ------
    if has_halo:
        top_row = jnp.maximum(t * TH - 1, 0)
        bot_row = jnp.minimum(t * TH + TH, H - 1)
        cp_top = pltpu.make_async_copy(xh_ref.at[n, top_row], halo_ref.at[0],
                                       sem.at[0])
        cp_bot = pltpu.make_async_copy(xh_ref.at[n, bot_row], halo_ref.at[1],
                                       sem.at[1])
        cp_top.start()
        cp_bot.start()

    x = x_ref[0]                                   # (TH, Wp, Cin) io dtype
    xf = x.reshape(M, Cin)

    if has_halo:
        cp_top.wait()
        cp_bot.wait()
        top = halo_ref[0].astype(jnp.bfloat16)     # (Wp, Cin)
        bot = halo_ref[1].astype(jnp.bfloat16)
    else:
        top = jnp.zeros((Wp, Cin), jnp.bfloat16)
        bot = jnp.zeros((Wp, Cin), jnp.bfloat16)

    # ---- conv1 (1x1) + bn1 + relu: halo rows folded into ONE MXU dot --------
    xin = jnp.concatenate([top, xf.astype(jnp.bfloat16), bot], axis=0)  # (R,Cin)
    h1 = jnp.dot(xin, w1_ref[...], preferred_element_type=jnp.float32)  # (R, P)
    h1 = jnp.maximum(h1 * s1_ref[...] + b1_ref[...], 0.0)

    # Zero the halo rows that fall outside the image (conv2 pads with 0).
    flat = jax.lax.broadcasted_iota(jnp.int32, (R, 1), 0)
    drop = ((flat < Wp) & (t == 0)) | ((flat >= R - Wp) & (t == nt - 1))
    h1 = jnp.where(drop, 0.0, h1)

    # ---- conv2 (3x3, pad=1): kw taps via XLU roll + mask (bf16 at the concat,
    #      so the 3x-replicated buffer is half-width); kh taps are free row
    #      slices feeding 3 accumulated K=3P dots. -----------------------------
    wpos = flat % Wp
    h_left = jnp.where(wpos == 0, 0.0, pltpu.roll(h1, 1, axis=0))           # w-1
    h_right = jnp.where(wpos == w_real - 1, 0.0,
                        pltpu.roll(h1, R - 1, axis=0))                      # w+1
    h1c = jnp.concatenate([h_left.astype(jnp.bfloat16),
                           h1.astype(jnp.bfloat16),
                           h_right.astype(jnp.bfloat16)], axis=-1)   # (R, 3P)

    h2 = jnp.dot(h1c[0:M], w2_ref[0], preferred_element_type=jnp.float32)
    h2 = h2 + jnp.dot(h1c[Wp:Wp + M], w2_ref[1],
                      preferred_element_type=jnp.float32)
    h2 = h2 + jnp.dot(h1c[2 * Wp:2 * Wp + M], w2_ref[2],
                      preferred_element_type=jnp.float32)
    h2 = jnp.maximum(h2 * s2_ref[...] + b2_ref[...], 0.0)           # (M, P)

    # ---- conv3 (1x1) + bn3 + residual + relu --------------------------------
    h3 = jnp.dot(h2.astype(jnp.bfloat16), w3_ref[...],
                 preferred_element_type=jnp.float32)
    h3 = h3 * s3_ref[...] + b3_ref[...]
    out = jnp.maximum(h3 + xf.astype(jnp.float32), 0.0)             # (M, Cout)
    o_ref[0] = out.reshape(TH, Wp, Cout).astype(o_ref.dtype)


def _tile_vmem_bytes(TH, Wp, Cin, P, Cout, io_bytes):
    """Rough upper bound on live VMEM bytes for one (n, t) grid step."""
    R = (TH + 2) * Wp
    M = TH * Wp
    blocks = 2 * (M * Cin + M * Cout) * io_bytes          # double-buffered x / out
    weights = 2 * (Cin * P + 9 * P * P + P * Cout) * 2    # bf16, double-buffered
    bn = 2 * 2 * (2 * P + Cout) * 4
    halo = 2 * Wp * Cin * io_bytes
    inter = (R * Cin * 2                                  # xin (bf16)
             + 3 * R * P * 4                              # h1 + two rolled taps
             + R * 3 * P * 2                              # h1c (bf16)
             + M * 3 * P * 2                              # conv2 LHS slice
             + M * P * 4                                  # h2
             + 2 * M * Cout * 4)                          # h3 / out
    return blocks + weights + bn + halo + inter


def _choose_tile_h(N, H, Wp, Cin, P, Cout, io_bytes, budget=40 << 20):
    """Largest divisor of H within the VMEM budget; keep >=2 grid steps when
    N == 1 so both v7x TensorCores get work."""
    best = 1
    for th in range(1, H + 1):
        if H % th:
            continue
        if N == 1 and th == H and H > 1:
            continue
        if _tile_vmem_bytes(th, Wp, Cin, P, Cout, io_bytes) <= budget:
            best = th
    return best


def prepare_params(raw_params):
    """Cast weights to bf16 once; reshape the 3x3 weights to (kh, kw*cin, cout)."""
    (w1, s1, b1, w2, s2, b2, w3, s3, b3) = raw_params
    P = w1.shape[1]
    w2f = w2.reshape(3, 3 * P, P)                  # (kh, (kw, cin), cout)
    return (w1.astype(jnp.bfloat16), s1, b1,
            w2f.astype(jnp.bfloat16), s2, b2,
            w3.astype(jnp.bfloat16), s3, b3)


def bottleneck_forward_nhwc(x_nhwc, kernel_params, *, tile_h=None):
    (w1, s1, b1, w2f, s2, b2, w3, s3, b3) = kernel_params
    N, H, W, Cin = x_nhwc.shape
    P = w1.shape[1]
    Cout = w3.shape[1]
    assert Cin == Cout, "stride=1, downsample=None requires inplanes == planes*4"

    # Pad W to a multiple of 8 so the flattened (rows, channels) layout stays
    # sublane-aligned (14x14 / 7x7 stages).  Padded columns are discarded.
    Wp = ((W + 7) // 8) * 8
    if Wp != W:
        x_nhwc = jnp.pad(x_nhwc, ((0, 0), (0, 0), (0, Wp - W), (0, 0)))

    io_bytes = jnp.dtype(x_nhwc.dtype).itemsize
    if tile_h is None:
        tile_h = _choose_tile_h(N, H, Wp, Cin, P, Cout, io_bytes)
    assert H % tile_h == 0, "tile_h must divide H"
    nt = H // tile_h

    vmem_limit = int(min(max(2 * _tile_vmem_bytes(tile_h, Wp, Cin, P, Cout,
                                                  io_bytes),
                             32 << 20), 64 << 20))

    kernel = functools.partial(bottleneck_kernel, w_real=W, has_halo=(nt > 1))

    out = pl.pallas_call(
        kernel,
        out_shape=jax.ShapeDtypeStruct((N, H, Wp, Cout), x_nhwc.dtype),
        grid_spec=pltpu.PrefetchScalarGridSpec(
            num_scalar_prefetch=0,
            grid=(N, nt),
            in_specs=[
                pl.BlockSpec((1, tile_h, Wp, Cin), lambda n, t: (n, t, 0, 0)),
                pl.BlockSpec(memory_space=pl.ANY),              # halo src (HBM)
                pl.BlockSpec((Cin, P),      lambda n, t: (0, 0)),    # w1 (bf16)
                pl.BlockSpec((1, P),        lambda n, t: (0, 0)),    # s1
                pl.BlockSpec((1, P),        lambda n, t: (0, 0)),    # b1
                pl.BlockSpec((3, 3 * P, P), lambda n, t: (0, 0, 0)),  # w2 (bf16)
                pl.BlockSpec((1, P),        lambda n, t: (0, 0)),    # s2
                pl.BlockSpec((1, P),        lambda n, t: (0, 0)),    # b2
                pl.BlockSpec((P, Cout),     lambda n, t: (0, 0)),    # w3 (bf16)
                pl.BlockSpec((1, Cout),     lambda n, t: (0, 0)),    # s3
                pl.BlockSpec((1, Cout),     lambda n, t: (0, 0)),    # b3
            ],
            out_specs=pl.BlockSpec((1, tile_h, Wp, Cout),
                                   lambda n, t: (n, t, 0, 0)),
            scratch_shapes=[pltpu.VMEM((2, Wp, Cin), x_nhwc.dtype),
                            pltpu.SemaphoreType.DMA((2,))],
        ),
        compiler_params=pltpu.CompilerParams(
            dimension_semantics=("parallel", "parallel"),
            vmem_limit_bytes=vmem_limit),
    )(x_nhwc, x_nhwc, w1, s1, b1, w2f, s2, b2, w3, s3, b3)

    if Wp != W:
        out = out[:, :, :W, :]
    return out


def bottleneck_forward(x_nchw, raw_params, *, tile_h=None):
    """PyTorch-layout (NCHW) entry point.  In a chain of layers prefer
    bottleneck_forward_nhwc (optionally with bf16 activations) and drop the
    transpose pair."""
    kp = prepare_params(raw_params)
    x = jnp.transpose(x_nchw, (0, 2, 3, 1))        # NCHW -> NHWC
    out = bottleneck_forward_nhwc(x, kp, tile_h=tile_h)
    return jnp.transpose(out, (0, 3, 1, 2))        # NHWC -> NCHW


def fold_bn(gamma, beta, mean, var, eps=1e-5):
    scale = gamma / jnp.sqrt(var + eps)
    bias = beta - mean * scale
    return scale.reshape(1, -1), bias.reshape(1, -1)


def make_params(key, inplanes, planes, expansion=4):
    ks = jax.random.split(key, 15)
    w1 = 0.1 * jax.random.normal(ks[0], (inplanes, planes), jnp.float32)
    w2 = 0.1 * jax.random.normal(ks[1], (3, 3, planes, planes), jnp.float32)
    w3 = 0.1 * jax.random.normal(ks[2], (planes, planes * expansion), jnp.float32)

    def bn(k0, k1, k2, k3, c):
        gamma = 1.0 + 0.1 * jax.random.normal(k0, (c,), jnp.float32)
        beta = 0.1 * jax.random.normal(k1, (c,), jnp.float32)
        mean = 0.1 * jax.random.normal(k2, (c,), jnp.float32)
        var = jnp.abs(jax.random.normal(k3, (c,), jnp.float32)) + 0.5
        return fold_bn(gamma, beta, mean, var)

    s1, b1 = bn(ks[3], ks[4], ks[5], ks[6], planes)
    s2, b2 = bn(ks[7], ks[8], ks[9], ks[10], planes)
    s3, b3 = bn(ks[11], ks[12], ks[13], ks[14], planes * expansion)
    return (w1, s1, b1, w2, s2, b2, w3, s3, b3)


def bottleneck_reference(x_nchw, params):
    """Pure-JAX reference.  Conv operands are cast to bf16 with f32
    accumulation to mirror the kernel's MXU precision; BN affine, ReLU and
    the residual stay in f32 (same as the kernel)."""
    (w1, s1, b1, w2, s2, b2, w3, s3, b3) = params
    x = jnp.transpose(x_nchw, (0, 2, 3, 1))        # NHWC
    dn = ('NHWC', 'HWIO', 'NHWC')

    def conv(v, w, pad):
        return jax.lax.conv_general_dilated(
            v.astype(jnp.bfloat16), w.astype(jnp.bfloat16), (1, 1), pad,
            dimension_numbers=dn, preferred_element_type=jnp.float32)

    h = conv(x, w1.reshape(1, 1, *w1.shape), 'VALID')
    h = jnp.maximum(h * s1[0] + b1[0], 0.0)
    h = conv(h, w2, ((1, 1), (1, 1)))
    h = jnp.maximum(h * s2[0] + b2[0], 0.0)
    h = conv(h, w3.reshape(1, 1, *w3.shape), 'VALID')
    h = h * s3[0] + b3[0]
    out = jnp.maximum(h + x, 0.0)
    return jnp.transpose(out, (0, 3, 1, 2))


if __name__ == "__main__":
    key = jax.random.PRNGKey(0)

    # (N, inplanes, planes, H, W, tile_h)
    configs = [
        (2, 16, 4, 16, 16, None),   # auto tile_h -> full-H tile, no halo DMA
        (2, 16, 4, 16, 16, 8),      # explicit row tiling, exercises halo DMA
        (1, 16, 4, 14, 14, None),   # odd W -> padding path; N==1 -> H split
    ]
    for idx, (N, inplanes, planes, H, W, th) in enumerate(configs):
        kx, kp = jax.random.split(jax.random.fold_in(key, idx))
        x = jax.random.normal(kx, (N, inplanes, H, W), jnp.float32)
        params = make_params(kp, inplanes, planes)

        out = jax.block_until_ready(bottleneck_forward(x, params, tile_h=th))
        ref = bottleneck_reference(x, params)

        assert out.shape == (N, planes * 4, H, W)
        assert jnp.allclose(out, ref, rtol=2e-2, atol=2e-2), \
            f"mismatch vs reference (config {idx})"

    print("KERNEL_OK")
</pallas_src>

<mosaic_0001>
module attributes {stable_mosaic.version = 11 : i64} {
  func.func @bottleneck_kernel(%arg0: i32, %arg1: i32, %arg2: memref<1x16x16x16xf32, #tpu.memory_space<vmem>>, %arg3: memref<2x16x16x16xf32, #tpu.memory_space<any>>, %arg4: memref<16x4xbf16, #tpu.memory_space<vmem>>, %arg5: memref<1x4xf32, #tpu.memory_space<vmem>>, %arg6: memref<1x4xf32, #tpu.memory_space<vmem>>, %arg7: memref<3x12x4xbf16, #tpu.memory_space<vmem>>, %arg8: memref<1x4xf32, #tpu.memory_space<vmem>>, %arg9: memref<1x4xf32, #tpu.memory_space<vmem>>, %arg10: memref<4x16xbf16, #tpu.memory_space<vmem>>, %arg11: memref<1x16xf32, #tpu.memory_space<vmem>>, %arg12: memref<1x16xf32, #tpu.memory_space<vmem>>, %arg13: memref<1x16x16x16xf32, #tpu.memory_space<vmem>>, %arg14: memref<2x16x16xf32, #tpu.memory_space<vmem>>, %arg15: memref<2x!tpu.dma_semaphore, #tpu.memory_space<semaphore_mem>>) attributes {dimension_semantics = [#tpu.dimension_semantics<parallel>, #tpu.dimension_semantics<parallel>], iteration_bounds = array<i64: 2, 1>, scalar_prefetch = 0 : i64, scratch_operands = 2 : i64, tpu.core_type = #tpu.core_type<tc>, window_params = [{transform_indices = @transform_0, window_bounds = array<i64: 1, 16, 16, 16>}, {}, {pipeline_mode = #tpu.pipeline_mode<synchronous>, transform_indices = @transform_2, window_bounds = array<i64: 16, 4>}, {pipeline_mode = #tpu.pipeline_mode<synchronous>, transform_indices = @transform_3, window_bounds = array<i64: 1, 4>}, {pipeline_mode = #tpu.pipeline_mode<synchronous>, transform_indices = @transform_4, window_bounds = array<i64: 1, 4>}, {pipeline_mode = #tpu.pipeline_mode<synchronous>, transform_indices = @transform_5, window_bounds = array<i64: 3, 12, 4>}, {pipeline_mode = #tpu.pipeline_mode<synchronous>, transform_indices = @transform_6, window_bounds = array<i64: 1, 4>}, {pipeline_mode = #tpu.pipeline_mode<synchronous>, transform_indices = @transform_7, window_bounds = array<i64: 1, 4>}, {pipeline_mode = #tpu.pipeline_mode<synchronous>, transform_indices = @transform_8, window_bounds = array<i64: 4, 16>}, {pipeline_mode = #tpu.pipeline_mode<synchronous>, transform_indices = @transform_9, window_bounds = array<i64: 1, 16>}, {pipeline_mode = #tpu.pipeline_mode<synchronous>, transform_indices = @transform_10, window_bounds = array<i64: 1, 16>}, {transform_indices = @transform_11, window_bounds = array<i64: 1, 16, 16, 16>}]} {
    %c0 = arith.constant 0 : index
    %c0_0 = arith.constant 0 : index
    %c0_1 = arith.constant 0 : index
    %c0_2 = arith.constant 0 : index
    %0 = vector.load %arg2[%c0, %c0_0, %c0_1, %c0_2] : memref<1x16x16x16xf32, #tpu.memory_space<vmem>>, vector<1x16x16x16xf32>
    %1 = vector.shape_cast %0 : vector<1x16x16x16xf32> to vector<16x16x16xf32>
    %2 = vector.shape_cast %1 : vector<16x16x16xf32> to vector<256x16xf32>
    %cst = arith.constant 0.000000e+00 : bf16
    %3 = vector.broadcast %cst : bf16 to vector<16x16xbf16>
    %cst_3 = arith.constant 0.000000e+00 : bf16
    %4 = vector.broadcast %cst_3 : bf16 to vector<16x16xbf16>
    %5 = arith.truncf %2 : vector<256x16xf32> to vector<256x16xbf16>
    %6 = tpu.concatenate %3, %5, %4 in 0 : vector<16x16xbf16>, vector<256x16xbf16>, vector<16x16xbf16> -> vector<288x16xbf16>
    %c0_4 = arith.constant 0 : index
    %c0_5 = arith.constant 0 : index
    %7 = vector.load %arg4[%c0_4, %c0_5] : memref<16x4xbf16, #tpu.memory_space<vmem>>, vector<16x4xbf16>
    %cst_6 = arith.constant dense<0.000000e+00> : vector<288x4xf32>
    %8 = tpu.matmul %6, %7, %cst_6 {dimension_numbers = #tpu.dot_dimension_numbers<[1], [0], [0], [1], [0, 0, 1, 1], [], []>} : vector<288x16xbf16>, vector<16x4xbf16>, vector<288x4xf32> -> vector<288x4xf32>
    %c0_7 = arith.constant 0 : index
    %c0_8 = arith.constant 0 : index
    %9 = vector.load %arg5[%c0_7, %c0_8] : memref<1x4xf32, #tpu.memory_space<vmem>>, vector<1x4xf32>
    %10 = vector.broadcast %9 : vector<1x4xf32> to vector<288x4xf32>
    %11 = arith.mulf %8, %10 : vector<288x4xf32>
    %c0_9 = arith.constant 0 : index
    %c0_10 = arith.constant 0 : index
    %12 = vector.load %arg6[%c0_9, %c0_10] : memref<1x4xf32, #tpu.memory_space<vmem>>, vector<1x4xf32>
    %13 = vector.broadcast %12 : vector<1x4xf32> to vector<288x4xf32>
    %14 = arith.addf %11, %13 : vector<288x4xf32>
    %cst_11 = arith.constant 0.000000e+00 : f32
    %15 = vector.broadcast %cst_11 : f32 to vector<288x4xf32>
    %16 = arith.maximumf %14, %15 : vector<288x4xf32>
    %17 = tpu.iota {dimensions = array<i32: 0>} : vector<288x1xi32>
    %c16_i32 = arith.constant 16 : i32
    %18 = vector.broadcast %c16_i32 : i32 to vector<288x1xi32>
    %19 = arith.cmpi slt, %17, %18 : vector<288x1xi32>
    %c0_i32 = arith.constant 0 : i32
    %20 = arith.cmpi eq, %arg1, %c0_i32 : i32
    %21 = vector.broadcast %20 : i1 to vector<288x1xi1>
    %22 = arith.andi %19, %21 : vector<288x1xi1>
    %c272_i32 = arith.constant 272 : i32
    %23 = vector.broadcast %c272_i32 : i32 to vector<288x1xi32>
    %24 = arith.cmpi sge, %17, %23 : vector<288x1xi32>
    %c0_i32_12 = arith.constant 0 : i32
    %25 = arith.cmpi eq, %arg1, %c0_i32_12 : i32
    %26 = vector.broadcast %25 : i1 to vector<288x1xi1>
    %27 = arith.andi %24, %26 : vector<288x1xi1>
    %28 = arith.ori %22, %27 : vector<288x1xi1>
    %cst_13 = arith.constant 0.000000e+00 : f32
    %29 = vector.shape_cast %28 : vector<288x1xi1> to vector<288x1xi1>
    %30 = vector.broadcast %29 : vector<288x1xi1> to vector<288x4xi1>
    %31 = vector.broadcast %cst_13 : f32 to vector<288x4xf32>
    %32 = arith.select %30, %31, %16 : vector<288x4xi1>, vector<288x4xf32>
    %c16_i32_14 = arith.constant 16 : i32
    %c0_i32_15 = arith.constant 0 : i32
    %33 = arith.cmpi eq, %c16_i32_14, %c0_i32_15 : i32
    %c1_i32 = arith.constant 1 : i32
    %34 = arith.select %33, %c1_i32, %c16_i32_14 : i32
    %35 = vector.broadcast %34 : i32 to vector<288x1xi32>
    %36 = arith.remsi %17, %35 : vector<288x1xi32>
    %c0_i32_16 = arith.constant 0 : i32
    %37 = vector.broadcast %c0_i32_16 : i32 to vector<288x1xi32>
    %38 = arith.cmpi ne, %36, %37 : vector<288x1xi32>
    %c0_i32_17 = arith.constant 0 : i32
    %39 = vector.broadcast %c0_i32_17 : i32 to vector<288x1xi32>
    %40 = arith.cmpi slt, %36, %39 : vector<288x1xi32>
    %c0_i32_18 = arith.constant 0 : i32
    %41 = arith.cmpi slt, %34, %c0_i32_18 : i32
    %42 = vector.broadcast %41 : i1 to vector<288x1xi1>
    %43 = vector.broadcast %42 : vector<288x1xi1> to vector<288x1xi1>
    %44 = arith.xori %40, %43 : vector<288x1xi1>
    %45 = arith.andi %44, %38 : vector<288x1xi1>
    %46 = vector.broadcast %34 : i32 to vector<288x1xi32>
    %47 = arith.addi %36, %46 : vector<288x1xi32>
    %48 = arith.select %45, %47, %36 : vector<288x1xi1>, vector<288x1xi32>
    %c0_i32_19 = arith.constant 0 : i32
    %49 = vector.broadcast %c0_i32_19 : i32 to vector<288x1xi32>
    %50 = arith.cmpi eq, %48, %49 : vector<288x1xi32>
    %c1_i32_20 = arith.constant 1 : i32
    %51 = tpu.dynamic_rotate %32 by %c1_i32_20 dim 0 : vector<288x4xf32>, i32 -> vector<288x4xf32>
    %cst_21 = arith.constant 0.000000e+00 : f32
    %52 = vector.shape_cast %50 : vector<288x1xi1> to vector<288x1xi1>
    %53 = vector.broadcast %52 : vector<288x1xi1> to vector<288x4xi1>
    %54 = vector.broadcast %cst_21 : f32 to vector<288x4xf32>
    %55 = arith.select %53, %54, %51 : vector<288x4xi1>, vector<288x4xf32>
    %c15_i32 = arith.constant 15 : i32
    %56 = vector.broadcast %c15_i32 : i32 to vector<288x1xi32>
    %57 = arith.cmpi eq, %48, %56 : vector<288x1xi32>
    %c287_i32 = arith.constant 287 : i32
    %58 = tpu.dynamic_rotate %32 by %c287_i32 dim 0 : vector<288x4xf32>, i32 -> vector<288x4xf32>
    %cst_22 = arith.constant 0.000000e+00 : f32
    %59 = vector.shape_cast %57 : vector<288x1xi1> to vector<288x1xi1>
    %60 = vector.broadcast %59 : vector<288x1xi1> to vector<288x4xi1>
    %61 = vector.broadcast %cst_22 : f32 to vector<288x4xf32>
    %62 = arith.select %60, %61, %58 : vector<288x4xi1>, vector<288x4xf32>
    %63 = arith.truncf %55 : vector<288x4xf32> to vector<288x4xbf16>
    %64 = arith.truncf %32 : vector<288x4xf32> to vector<288x4xbf16>
    %65 = arith.truncf %62 : vector<288x4xf32> to vector<288x4xbf16>
    %66 = tpu.concatenate %63, %64, %65 in 1 : vector<288x4xbf16>, vector<288x4xbf16>, vector<288x4xbf16> -> vector<288x12xbf16>
    %67 = vector.extract_strided_slice %66 {offsets = [0, 0], sizes = [256, 12], strides = [1, 1]} : vector<288x12xbf16> to vector<256x12xbf16>
    %c0_23 = arith.constant 0 : index
    %c0_24 = arith.constant 0 : index
    %c0_25 = arith.constant 0 : index
    %68 = vector.load %arg7[%c0_23, %c0_24, %c0_25] : memref<3x12x4xbf16, #tpu.memory_space<vmem>>, vector<1x12x4xbf16>
    %69 = vector.shape_cast %68 : vector<1x12x4xbf16> to vector<12x4xbf16>
    %cst_26 = arith.constant dense<0.000000e+00> : vector<256x4xf32>
    %70 = tpu.matmul %67, %69, %cst_26 {dimension_numbers = #tpu.dot_dimension_numbers<[1], [0], [0], [1], [0, 0, 1, 1], [], []>} : vector<256x12xbf16>, vector<12x4xbf16>, vector<256x4xf32> -> vector<256x4xf32>
    %71 = vector.extract_strided_slice %66 {offsets = [16, 0], sizes = [256, 12], strides = [1, 1]} : vector<288x12xbf16> to vector<256x12xbf16>
    %c1 = arith.constant 1 : index
    %c0_27 = arith.constant 0 : index
    %c0_28 = arith.constant 0 : index
    %72 = vector.load %arg7[%c1, %c0_27, %c0_28] : memref<3x12x4xbf16, #tpu.memory_space<vmem>>, vector<1x12x4xbf16>
    %73 = vector.shape_cast %72 : vector<1x12x4xbf16> to vector<12x4xbf16>
    %cst_29 = arith.constant dense<0.000000e+00> : vector<256x4xf32>
    %74 = tpu.matmul %71, %73, %cst_29 {dimension_numbers = #tpu.dot_dimension_numbers<[1], [0], [0], [1], [0, 0, 1, 1], [], []>} : vector<256x12xbf16>, vector<12x4xbf16>, vector<256x4xf32> -> vector<256x4xf32>
    %75 = arith.addf %70, %74 : vector<256x4xf32>
    %76 = vector.extract_strided_slice %66 {offsets = [32, 0], sizes = [256, 12], strides = [1, 1]} : vector<288x12xbf16> to vector<256x12xbf16>
    %c2 = arith.constant 2 : index
    %c0_30 = arith.constant 0 : index
    %c0_31 = arith.constant 0 : index
    %77 = vector.load %arg7[%c2, %c0_30, %c0_31] : memref<3x12x4xbf16, #tpu.memory_space<vmem>>, vector<1x12x4xbf16>
    %78 = vector.shape_cast %77 : vector<1x12x4xbf16> to vector<12x4xbf16>
    %cst_32 = arith.constant dense<0.000000e+00> : vector<256x4xf32>
    %79 = tpu.matmul %76, %78, %cst_32 {dimension_numbers = #tpu.dot_dimension_numbers<[1], [0], [0], [1], [0, 0, 1, 1], [], []>} : vector<256x12xbf16>, vector<12x4xbf16>, vector<256x4xf32> -> vector<256x4xf32>
    %80 = arith.addf %75, %79 : vector<256x4xf32>
    %c0_33 = arith.constant 0 : index
    %c0_34 = arith.constant 0 : index
    %81 = vector.load %arg8[%c0_33, %c0_34] : memref<1x4xf32, #tpu.memory_space<vmem>>, vector<1x4xf32>
    %82 = vector.broadcast %81 : vector<1x4xf32> to vector<256x4xf32>
    %83 = arith.mulf %80, %82 : vector<256x4xf32>
    %c0_35 = arith.constant 0 : index
    %c0_36 = arith.constant 0 : index
    %84 = vector.load %arg9[%c0_35, %c0_36] : memref<1x4xf32, #tpu.memory_space<vmem>>, vector<1x4xf32>
    %85 = vector.broadcast %84 : vector<1x4xf32> to vector<256x4xf32>
    %86 = arith.addf %83, %85 : vector<256x4xf32>
    %cst_37 = arith.constant 0.000000e+00 : f32
    %87 = vector.broadcast %cst_37 : f32 to vector<256x4xf32>
    %88 = arith.maximumf %86, %87 : vector<256x4xf32>
    %89 = arith.truncf %88 : vector<256x4xf32> to vector<256x4xbf16>
    %c0_38 = arith.constant 0 : index
    %c0_39 = arith.constant 0 : index
    %90 = vector.load %arg10[%c0_38, %c0_39] : memref<4x16xbf16, #tpu.memory_space<vmem>>, vector<4x16xbf16>
    %cst_40 = arith.constant dense<0.000000e+00> : vector<256x16xf32>
    %91 = tpu.matmul %89, %90, %cst_40 {dimension_numbers = #tpu.dot_dimension_numbers<[1], [0], [0], [1], [0, 0, 1, 1], [], []>} : vector<256x4xbf16>, vector<4x16xbf16>, vector<256x16xf32> -> vector<256x16xf32>
    %c0_41 = arith.constant 0 : index
    %c0_42 = arith.constant 0 : index
    %92 = vector.load %arg11[%c0_41, %c0_42] : memref<1x16xf32, #tpu.memory_space<vmem>>, vector<1x16xf32>
    %93 = vector.broadcast %92 : vector<1x16xf32> to vector<256x16xf32>
    %94 = arith.mulf %91, %93 : vector<256x16xf32>
    %c0_43 = arith.constant 0 : index
    %c0_44 = arith.constant 0 : index
    %95 = vector.load %arg12[%c0_43, %c0_44] : memref<1x16xf32, #tpu.memory_space<vmem>>, vector<1x16xf32>
    %96 = vector.broadcast %95 : vector<1x16xf32> to vector<256x16xf32>
    %97 = arith.addf %94, %96 : vector<256x16xf32>
    %98 = arith.addf %97, %2 : vector<256x16xf32>
    %cst_45 = arith.constant 0.000000e+00 : f32
    %99 = vector.broadcast %cst_45 : f32 to vector<256x16xf32>
    %100 = arith.maximumf %98, %99 : vector<256x16xf32>
    %101 = vector.shape_cast %100 : vector<256x16xf32> to vector<16x16x16xf32>
    %c0_46 = arith.constant 0 : index
    %c0_47 = arith.constant 0 : index
    %c0_48 = arith.constant 0 : index
    %c0_49 = arith.constant 0 : index
    %102 = vector.load %arg13[%c0_46, %c0_47, %c0_48, %c0_49] : memref<1x16x16x16xf32, #tpu.memory_space<vmem>>, vector<1x16x16x16xf32>
    %103 = vector.shape_cast %102 : vector<1x16x16x16xf32> to vector<16x16x16xf32>
    %104 = vector.shape_cast %101 : vector<16x16x16xf32> to vector<1x16x16x16xf32>
    tpu.vector_store %arg13[%c0_46, %c0_47, %c0_48, %c0_49], %104 {strides = array<i32>} : memref<1x16x16x16xf32, #tpu.memory_space<vmem>>, vector<1x16x16x16xf32>,
    return
  }
  func.func @transform_0(%arg0: i32, %arg1: i32) -> (i32, i32, i32, i32) {
    %c0_i32 = arith.constant 0 : i32
    %c0_i32_0 = arith.constant 0 : i32
    %c0_i32_1 = arith.constant 0 : i32
    return %arg0, %arg1, %c0_i32, %c0_i32_0 : i32, i32, i32, i32
  }
  func.func @transform_2(%arg0: i32, %arg1: i32) -> (i32, i32) {
    %c0_i32 = arith.constant 0 : i32
    %c0_i32_0 = arith.constant 0 : i32
    %c0_i32_1 = arith.constant 0 : i32
    return %c0_i32, %c0_i32_0 : i32, i32
  }
  func.func @transform_3(%arg0: i32, %arg1: i32) -> (i32, i32) {
    %c0_i32 = arith.constant 0 : i32
    %c0_i32_0 = arith.constant 0 : i32
    %c0_i32_1 = arith.constant 0 : i32
    return %c0_i32, %c0_i32_0 : i32, i32
  }
  func.func @transform_4(%arg0: i32, %arg1: i32) -> (i32, i32) {
    %c0_i32 = arith.constant 0 : i32
    %c0_i32_0 = arith.constant 0 : i32
    %c0_i32_1 = arith.constant 0 : i32
    return %c0_i32, %c0_i32_0 : i32, i32
  }
  func.func @transform_5(%arg0: i32, %arg1: i32) -> (i32, i32, i32) {
    %c0_i32 = arith.constant 0 : i32
    %c0_i32_0 = arith.constant 0 : i32
    %c0_i32_1 = arith.constant 0 : i32
    %c0_i32_2 = arith.constant 0 : i32
    return %c0_i32, %c0_i32_0, %c0_i32_1 : i32, i32, i32
  }
  func.func @transform_6(%arg0: i32, %arg1: i32) -> (i32, i32) {
    %c0_i32 = arith.constant 0 : i32
    %c0_i32_0 = arith.constant 0 : i32
    %c0_i32_1 = arith.constant 0 : i32
    return %c0_i32, %c0_i32_0 : i32, i32
  }
  func.func @transform_7(%arg0: i32, %arg1: i32) -> (i32, i32) {
    %c0_i32 = arith.constant 0 : i32
    %c0_i32_0 = arith.constant 0 : i32
    %c0_i32_1 = arith.constant 0 : i32
    return %c0_i32, %c0_i32_0 : i32, i32
  }
  func.func @transform_8(%arg0: i32, %arg1: i32) -> (i32, i32) {
    %c0_i32 = arith.constant 0 : i32
    %c0_i32_0 = arith.constant 0 : i32
    %c0_i32_1 = arith.constant 0 : i32
    return %c0_i32, %c0_i32_0 : i32, i32
  }
  func.func @transform_9(%arg0: i32, %arg1: i32) -> (i32, i32) {
    %c0_i32 = arith.constant 0 : i32
    %c0_i32_0 = arith.constant 0 : i32
    %c0_i32_1 = arith.constant 0 : i32
    return %c0_i32, %c0_i32_0 : i32, i32
  }
  func.func @transform_10(%arg0: i32, %arg1: i32) -> (i32, i32) {
    %c0_i32 = arith.constant 0 : i32
    %c0_i32_0 = arith.constant 0 : i32
    %c0_i32_1 = arith.constant 0 : i32
    return %c0_i32, %c0_i32_0 : i32, i32
  }
  func.func @transform_11(%arg0: i32, %arg1: i32) -> (i32, i32, i32, i32) {
    %c0_i32 = arith.constant 0 : i32
    %c0_i32_0 = arith.constant 0 : i32
    %c0_i32_1 = arith.constant 0 : i32
    return %arg0, %arg1, %c0_i32, %c0_i32_0 : i32, i32, i32, i32
  }
}

</mosaic_0001>

<bundles_post_ra>
// kernel: tpu_custom_call.1
= control target key start
LH: loop header
LB: loop body
LE: loop exit
PB: predicated region body
PF: predicated region fallthrough
CT: control target
= control target key end

     0   :  { %16 = vsyncpa [#allocation5], 0  ;;  %s5202_s0 = inlined_call_operand.hbm [shape: f32[2,16,16,16], index: 0, kind: input, shape index: {}]   ;;  %s5203_s1 = inlined_call_operand.hbm [shape: f32[2,16,16,16], index: 1, kind: input, shape index: {}]   ;;  %s5204_s2 = inlined_call_operand.vmem [shape: bf16[16,4], index: 2, kind: input, shape index: {}]   ;;  %s5205_s3 = inlined_call_operand.vmem [shape: f32[1,4], index: 3, kind: input, shape index: {}]   ;;  %s5206_s4 = inlined_call_operand.vmem [shape: f32[1,4], index: 4, kind: input, shape index: {}]   ;;  %s5207_s5 = inlined_call_operand.vmem [shape: bf16[3,12,4], index: 5, kind: input, shape index: {}]   ;;  %s5208_s6 = inlined_call_operand.vmem [shape: f32[1,4], index: 6, kind: input, shape index: {}]   ;;  %s5209_s7 = inlined_call_operand.vmem [shape: f32[1,4], index: 7, kind: input, shape index: {}]   ;;  %s5210_s8 = inlined_call_operand.vmem [shape: bf16[4,16], index: 8, kind: input, shape index: {}]   ;;  %s5211_s9 = inlined_call_operand.vmem [shape: f32[1,16], index: 9, kind: input, shape index: {}]   ;;  %s5212_s10 = inlined_call_operand.vmem [shape: f32[1,16], index: 10, kind: input, shape index: {}]   ;;  %s5213_s11 = inlined_call_operand.hbm [shape: f32[2,16,16,16], index: 11, kind: output, shape index: {}]  }
   0x1   :  { %18 = vsyncpa [#allocation5 + $0x1], 0 }
   0x2   :  { %19 = vsyncpa [#allocation6], 0 }
   0x3   :  { %21 = vsyncpa [#allocation6 + $0x1], 0  ;;  %s3895_s16 = smov 0   ;;  %s3897_s17 = smov 0  }
   0x4   :  { %s3899_s18 = smov 0   ;;  %s3901_s19 = smov 0  }
   0x5   :  { %s3903_s20 = smov 0   ;;  %s3905_s21 = smov 0  }
   0x6 LB: > { %5246 = sst [smem:[#allocation10_spill]] %s3805_s16  ;;  %s3477_s22 = sadd.s32 4294967295, %s3825_s21   ;;  %s3825_s21 = sphi %s3905_s21, %s27_s21   ;;  %s3821_s20 = sphi %s3903_s20, %s5341_s20   ;;  %s3817_s19 = sphi %s3901_s19, %s5340_s19   ;;  %s3813_s18 = sphi %s3899_s18, %s5344_s18   ;;  %s3809_s17 = sphi %s3897_s17, %s5343_s17   ;;  %s3805_s16 = sphi %s3895_s16, %s5342_s16  }
   0x7   : > { %5247 = sst [smem:[#allocation11_spill]] %s3821_s20  ;;  %s3478_s23 = sadd.s32 4294967294, %s3825_s21  }
   0x8   : > { %s39_s24 = sadd.s32 1, %s3821_s20  ;;  %s48_s25 = sadd.s32 1, %s3813_s18 }
   0x9   : > { %p41_p0 = scmp.ge.s32.totalorder %s39_s24, 2  ;;  %p55_p1 = scmp.ne.s32.totalorder %s3813_s18, %s3809_s17 }
   0xa   : > { %p56_p2 = scmp.eq.s32.totalorder %s3825_s21, 0  ;;  %p61_p3 = scmp.ne.s32.totalorder %s3809_s17, %s3805_s16 }
   0xb   : > { %s5346_s24 = smov (%p41_p0, %s39_s24), 0  ;;  %p62_p5 = scmp.eq.s32.totalorder %s3477_s22, 0 }
   0xc   : > { %5248 = sst [smem:[#allocation12_spill]] %s5346_s24  ;;  %p3936_p4 = por %p56_p2, %p55_p1 }
   0xd   : > { %s43_s27 = ssub.s32 %s3821_s20, %s5346_s24  ;;  %p276_p6 = scmp.eq.s32.totalorder %s3477_s22, 1 }
   0xe   : > { %p46_p7 = scmp.eq.s32.totalorder %s43_s27, 0  ;;  %p3942_p8 = por %p62_p5, %p61_p3 }
   0xf   : > { %p3946_p9 = por %p276_p6, %p55_p1  ;;  %p282_p10 = scmp.eq.s32.totalorder %s3478_s23, 1 }
  0x10   : > { %s3951_s29 = scalar_select %p46_p7, %s3813_s18, %s48_s25  }
  0x11   : > { %s5251_s1 = scalar_select %p3946_p9, 1, 0 }
  0x12   : > { %5253 = sst [smem:[#allocation14_spill]] %s3951_s29  ;;  %p3953_p11 = por %p282_p10, %p61_p3 }
  0x13   : > { %5252 = sst [smem:[#allocation13_spill]] %s5251_s1  ;;  %p3480_p12 = scmp.ge.s32.totalorder %s3825_s21, 2 }
  0x14   : > { %p3615_p13 = scmp.lt.s32.totalorder %s3825_s21, 2  ;;  %s329_s12 = sand.u32 1, %s3813_s18  }
  0x15   : > { %s3481_s13 = sshll.u32 %s329_s12, 8  ;;  %s3594_s14 = sshll.u32 %s3821_s20, 8 }
  0x16   : > { %s341_s27 = scalar_lea.hbm %s5202_s0, %s3594_s14  ;;  %s333_s24 = scalar_lea.vmem [#allocation4], %s3481_s13 }
  0x17   : > { %s344_s16 = sshll.u32 %s333_s24, 4  ;;  %s342_s1 = sshll.u32 %s341_s27, 4  ;;  %s345_s16 = int_to_ptr.vmem [resolvable:$true] %s344_s16  ;;  %s343_s1 = int_to_ptr.hbm [resolvable:$true] %s342_s1 }
  0x18   : > { %p3608_p0 = pnand %p3615_p13, %p3936_p4  ;;  %p3484_p1 = scmp.ge.s32.totalorder %s3825_s21, 1 }
  0x19   : > { %s330_s23 = scalar_lea.sflag [#allocation5], %s329_s12  ;;  %s3827_s25 = smov 128  }
  0x1a   : > { %s3828_s29 = smov 8   ;;  %p352_p2 = scmp.lt.s32.totalorder %s3825_s21, 3 }
  0x1b   : > { %3610 = dma.hbm_to_vmem [thread:$0]  (!%p3608_p0), %s343_s1, 4096, %s345_s16, %s330_s23, %s3827_s25, %s3827_s25, %s3828_s29  }
  0x1c   : > { %p353_p3 = pnand %p3484_p1, %p352_p2 }
  0x1e   : > { %356 = sbr.rel (%p353_p3) target bundleno = 1126 (0x466), region = 60 }
  0x23   : > { %s3969_s20 = sand.u32 1, %s3809_s17  }
  0x24   : > { %s3485_s24 = sshll.u32 %s3969_s20, 8  ;;  %s359_s13 = scalar_lea.sflag [#allocation5], %s3969_s20 }
  0x25   : > { %s3975_s26 = scalar_lea.vmem [#allocation4], %s3485_s24 }
  0x26   : > { %3796 = dma.done.wait (%p3942_p8), %s359_s13, 4096  }
  0x27   : > { %3798 = vsyncadd (%p3942_p8), %s359_s13, 4294963200  ;;  %v3595_v0 = vld [vmem:[%s5204_s2] sm:$0xff]  ;;  %v5221_v1 = vmov 0   ;;  %v404_v3 = vld [vmem:[%s3975_s26 + $0x8] sm:$0xff]  ;;  %vm555_vm0 = vcmask 130048   ;;  %vm2602_vm14 = vcmask 1045504  }
  0x28   : > { %614 = vmatpush.bf16.msra.mxu0 %v3595_v0  ;;  %v403_v2 = vld [vmem:[%s3975_s26] sm:$0xff]  ;;  %v436_v5 = vpack.c.bf16 %v404_v3, %v404_v3  ;;  %v405_v9 = vld [vmem:[%s3975_s26 + $0x10] sm:$0xff]  ;;  %v406_v10 = vld [vmem:[%s3975_s26 + $0x18] sm:$0xff]  ;;  %v822_v0 = vlaneseq  ;;  %s3831_s25 = smov 4   ;;  %s3832_s13 = smov 8  }
  0x29   : > { %v435_v4 = vpack.c.bf16 %v403_v2, %v403_v2  ;;  %v437_v11 = vpack.c.bf16 %v405_v9, %v405_v9  ;;  %v438_v12 = vpack.c.bf16 %v406_v10, %v406_v10  ;;  %v407_v16 = vld [vmem:[%s3975_s26 + $0x20] sm:$0xff]  ;;  %v408_v17 = vld [vmem:[%s3975_s26 + $0x28] sm:$0xff]  ;;  %v409_v23 = vld [vmem:[%s3975_s26 + $0x30] sm:$0xff]  ;;  %s4957_s1 = scalar_lea.vmem [#allocation7], %s3485_s24  ;;  %s3599_s24 = sshll.u32 %s3817_s19, 8 }
  0x2a   : > { %v500_v7 = vunpack.c.l.b16 %v436_v5  ;;  %v439_v18 = vpack.c.bf16 %v407_v16, %v407_v16  ;;  %v440_v19 = vpack.c.bf16 %v408_v17, %v408_v17  ;;  %v410_v24 = vld [vmem:[%s3975_s26 + $0x38] sm:$0xff]  ;;  %v441_v25 = vpack.c.bf16 %v409_v23, %v409_v23  ;;  %v411_v30 = vld [vmem:[%s3975_s26 + $0x40] sm:$0xff]  ;;  %v412_v31 = vld [vmem:[%s3975_s26 + $0x48] sm:$0xff]  ;;  %s3373_s12 = scalar_lea.hbm %s5213_s11, %s3599_s24  ;;  %s3374_s14 = sshll.u32 %s4957_s1, 4  ;;  %s3375_s14 = int_to_ptr.vmem [resolvable:$true] %s3374_s14 }
  0x2b   : > { %615 = vmatmul.bf16.vlgmr.msra.gmra.mxu0 %v5221_v1  ;;  %v499_v6 = vunpack.c.l.b16 %v435_v4  ;;  %v501_v13 = vunpack.c.l.b16 %v437_v11  ;;  %v502_v14 = vunpack.c.l.b16 %v438_v12  ;;  %v442_v26 = vpack.c.bf16 %v410_v24, %v410_v24  ;;  %v413_v37 = vld [vmem:[%s3975_s26 + $0x50] sm:$0xff]  ;;  %v414_v38 = vld [vmem:[%s3975_s26 + $0x58] sm:$0xff]  ;;  %v415_v44 = vld [vmem:[%s3975_s26 + $0x60] sm:$0xff]  ;;  %s3376_s15 = sshll.u32 %s3373_s12, 4  ;;  %s3359_s19 = scalar_lea.sflag [#allocation6], %s3969_s20  ;;  %s3377_s15 = int_to_ptr.hbm [resolvable:$true] %s3376_s15 }
  0x2c   : > { %v503_v20 = vunpack.c.l.b16 %v439_v18  ;;  %v504_v21 = vunpack.c.l.b16 %v440_v19  ;;  %v505_v27 = vunpack.c.l.b16 %v441_v25  ;;  %v443_v32 = vpack.c.bf16 %v411_v30, %v411_v30  ;;  %v416_v45 = vld [vmem:[%s3975_s26 + $0x68] sm:$0xff]  ;;  %v417_v51 = vld [vmem:[%s3975_s26 + $0x70] sm:$0xff]  ;;  %v418_v52 = vld [vmem:[%s3975_s26 + $0x78] sm:$0xff]  ;;  %s3757_s22 = sshra.s32 %s3377_s15, 4  ;;  %s3763_s24 = scalar_lea.hbm %s5213_s11, 512  ;;  %s3758_s22 = int_to_ptr.hbm [resolvable:$true] %s3757_s22 }
  0x2d   : > { %v531_v8 = vpack.c.b16 %v500_v7, %v499_v6  ;;  %v532_v15 = vpack.c.b16 %v502_v14, %v501_v13  ;;  %v506_v28 = vunpack.c.l.b16 %v442_v26  ;;  %v444_v33 = vpack.c.bf16 %v412_v31, %v412_v31  ;;  %v419_v59 = vld [vmem:[%s3975_s26 + $0x80] sm:$0xff]  ;;  %v420_v60 = vld [vmem:[%s3975_s26 + $0x88] sm:$0xff]  ;;  %v421_v12 = vld [vmem:[%s3975_s26 + $0x90] sm:$0xff]  ;;  %s3759_s27 = scalar_lea.hbm %s3758_s22, 256  ;;  %p3764_p7 = scmp.lt.s32.totalorder %s3758_s22, %s5213_s11 }
  0x2e   : > { %v533_v22 = vpack.c.b16 %v504_v21, %v503_v20  ;;  %v507_v34 = vunpack.c.l.b16 %v443_v32  ;;  %v445_v39 = vpack.c.bf16 %v413_v37, %v413_v37  ;;  %v446_v40 = vpack.c.bf16 %v414_v38, %v414_v38  ;;  %v4014_v4 = vld [vmem:[%s5205_s3] ss:$0 sm:$0xff]  ;;  %v422_v13 = vld [vmem:[%s3975_s26 + $0x98] sm:$0xff]  ;;  %p3760_p4 = scmp.ne.s32.totalorder %s3758_s22, %s3759_s27  ;;  %p3765_p8 = scmp.lt.s32.totalorder %s3763_s24, %s3759_s27 }
  0x2f   : > { %v534_v29 = vpack.c.b16 %v506_v28, %v505_v27  ;;  %v508_v35 = vunpack.c.l.b16 %v444_v33  ;;  %v447_v46 = vpack.c.bf16 %v415_v44, %v415_v44  ;;  %v448_v47 = vpack.c.bf16 %v416_v45, %v416_v45  ;;  %v4021_v6 = vld [vmem:[%s5206_s4] ss:$0 sm:$0xff] }
  0x30   : > { %v509_v41 = vunpack.c.l.b16 %v445_v39  ;;  %v510_v42 = vunpack.c.l.b16 %v446_v40  ;;  %v449_v53 = vpack.c.bf16 %v417_v51, %v417_v51  ;;  %v450_v54 = vpack.c.bf16 %v418_v52, %v418_v52  ;;  %p3761_p5 = pnand %p3760_p4, %p3946_p9  ;;  %p3766_p10 = por %p3765_p8, %p3764_p7 }
  0x31   : > { %v535_v36 = vpack.c.b16 %v508_v35, %v507_v34  ;;  %v511_v48 = vunpack.c.l.b16 %v447_v46  ;;  %v512_v49 = vunpack.c.l.b16 %v448_v47  ;;  %v451_v61 = vpack.c.bf16 %v419_v59, %v419_v59  ;;  %v423_v47 = vld [vmem:[%s3975_s26 + $0xa0] sm:$0xff] }
  0x32   : > { %v536_v43 = vpack.c.b16 %v510_v42, %v509_v41  ;;  %v513_v55 = vunpack.c.l.b16 %v449_v53  ;;  %v514_v56 = vunpack.c.l.b16 %v450_v54  ;;  %v452_v62 = vpack.c.bf16 %v420_v60, %v420_v60  ;;  %p3762_p6 = pneg %p3761_p5 }
  0x33   : > { %v537_v50 = vpack.c.b16 %v512_v49, %v511_v48  ;;  %v515_v2 = vunpack.c.l.b16 %v451_v61  ;;  %v4016_v5 = vshrl.u32 %v822_v0, 7  ;;  %v453_v19 = vpack.c.bf16 %v421_v12, %v421_v12  ;;  %v424_v48 = vld [vmem:[%s3975_s26 + $0xa8] sm:$0xff] }
  0x34   : > { %v538_v57 = vpack.c.b16 %v514_v56, %v513_v55  ;;  %v516_v3 = vunpack.c.l.b16 %v452_v62  ;;  %v454_v20 = vpack.c.bf16 %v422_v13, %v422_v13  ;;  %p3767_p13 = pnand %p3766_p10, %p3762_p6 }
  0x35   : > { %v825_v10 = vadd.s32 16, %v4016_v5  ;;  %vm1655_vm1 = vcmp.lt.s32.totalorder %v4016_v5, 1  ;;  %v517_v25 = vunpack.c.l.b16 %v453_v19  ;;  %v826_v30 = vadd.s32 24, %v4016_v5 }
  0x36   : > { %v539_v7 = vpack.c.b16 %v516_v3, %v515_v2  ;;  %v518_v26 = vunpack.c.l.b16 %v454_v20  ;;  %vm1872_vm3 = vcmp.lt.s32.totalorder %v4016_v5, 7  ;;  %v827_v40 = vadd.s32 32, %v4016_v5 }
  0x37   : > { %v1169_v17 = vand.u32 15, %v825_v10  ;;  %v1176_v44 = vand.u32 15, %v826_v30  ;;  %v828_v12 = vadd.s32 40, %v4016_v5  ;;  %v838_v1 = vadd.s32 120, %v4016_v5 }
  0x38   : > { %v540_v34 = vpack.c.b16 %v518_v26, %v517_v25  ;;  %v1183_v53 = vand.u32 15, %v827_v40 }
  0x39   : > { %vm1585_vm2 = vcmp.eq.s32.totalorder %v1169_v17, 0  ;;  %vm1803_vm4 = vcmp.eq.s32.totalorder %v1176_v44, 15 }
  0x3a   : > { %vm1587_vm5 = vcmp.eq.s32.totalorder %v1183_v53, 0 }
  0x3b   : > { %3491 = vmatmul.msk.bf16.gmra.mxu0 %vm555_vm0, %v531_v8 }
  0x4b   : > { %3492 = vmatmul.msk.bf16.gmra.mxu0 %vm555_vm0, %v532_v15  ;;  %v5220_v15 = vmov 0.0  }
  0x4c   : > { %v4032_v16 = vrot.slane %v5220_v15, 7 }
  0x4e   : > { %5255 = vst [vmem:[#allocation15_spill] sm:$0xff] %v4032_v16 }
  0x5b   : > { %3493 = vmatmul.msk.bf16.gmra.mxu0 %vm555_vm0, %v533_v22 }
  0x6b   : > { %3494 = vmatmul.msk.bf16.gmra.mxu0 %vm555_vm0, %v534_v29 }
  0x7b   : > { %3495 = vmatmul.msk.bf16.gmra.mxu0 %vm555_vm0, %v535_v36 }
  0x8b   : > { %3496 = vmatmul.msk.bf16.gmra.mxu0 %vm555_vm0, %v536_v43 }
  0x9b   : > { %3497 = vmatmul.msk.bf16.gmra.mxu0 %vm555_vm0, %v537_v50 }
  0xa8   : > { %v616_v58 = vpop.f32.mrf.mxu0 }
  0xa9   : > { %v456_v58 = vpack.c.bf16 %v424_v48, %v424_v48 }
  0xab   : > { %3498 = vmatmul.msk.bf16.gmra.mxu0 %vm555_vm0, %v538_v57  ;;  %v455_v57 = vpack.c.bf16 %v423_v47, %v423_v47 }
  0xad   : > { %v519_v3 = vunpack.c.l.b16 %v455_v57 }
  0xb0   : > { %v618_v63 = vpop.f32.mrf.mxu0 }
  0xb8   : > { %v621_v8 = vpop.f32.mrf.mxu0 }
  0xb9   : > { %v712_v9 = vmul.f32 %v4014_v4, %v621_v8 }
  0xbb   : > { %v752_v11 = vadd.f32 %v4021_v6, %v712_v9  ;;  %3499 = vmatmul.msk.bf16.gmra.mxu0 %vm555_vm0, %v539_v7  ;;  %v520_v7 = vunpack.c.l.b16 %v456_v58 }
  0xbd   : > { %v4029_v14 = vmax.f32 %v752_v11, 0.0  ;;  %v541_v20 = vpack.c.b16 %v520_v7, %v519_v3 }
  0xbf   : > { %v1621_v18 = vrot.slane %v4029_v14, 7  ;;  %v2055_v29 = vpack.c.bf16 %v4029_v14, %v4029_v14  ;;  %v5219_v31 = vrot.slane %v4029_v14, 1 }
  0xc0   : > { %v623_v21 = vpop.f32.mrf.mxu0 }
  0xc1   : > { %v713_v22 = vmul.f32 %v4014_v4, %v623_v21  ;;  %v1689_v23 = vsel %vm1655_vm1, %v4032_v16, %v1621_v18  ;;  %v4054_v42 = vunpack.c.l.b16 %v2055_v29  ;;  %v1190_v29 = vand.u32 15, %v828_v12 }
  0xc2   : > { %v1766_v28 = vsel %vm1585_vm2, 0.0, %v1689_v23 }
  0xc3   : > { %v753_v24 = vadd.f32 %v4021_v6, %v713_v22  ;;  %v2019_v37 = vpack.c.bf16 %v1766_v28, %v1766_v28  ;;  %vm1805_vm6 = vcmp.eq.s32.totalorder %v1190_v29, 15 }
  0xc5   : > { %v789_v27 = vmax.f32 %v753_v24, 0.0  ;;  %v4064_v50 = vunpack.c.l.b16 %v2019_v37 }
  0xc7   : > { %v1622_v32 = vrot.slane %v789_v27, 7  ;;  %v1839_v33 = vrot.slane %v789_v27, 1  ;;  %v2056_v36 = vpack.c.bf16 %v789_v27, %v789_v27  ;;  %5256 = vst [vmem:[#allocation16_spill] sm:$0xff] %v4064_v50  ;;  %v829_v27 = vadd.s32 48, %v4016_v5 }
  0xc8   : > { %v626_v35 = vpop.f32.mrf.mxu0 }
  0xc9   : > { %v714_v38 = vmul.f32 %v4014_v4, %v626_v35  ;;  %v1905_v39 = vsel %vm1872_vm3, %v5219_v31, %v1839_v33  ;;  %v1688_v41 = vsel %vm1655_vm1, %v1621_v18, %v1622_v32  ;;  %v4056_v43 = vunpack.c.l.b16 %v2056_v36  ;;  %v425_v35 = vld [vmem:[%s3975_s26 + $0xb0] sm:$0xff]  ;;  %v426_v36 = vld [vmem:[%s3975_s26 + $0xb8] sm:$0xff] }
  0xca   : > { %v2020_v45 = vpack.c.bf16 %v1688_v41, %v1688_v41  ;;  %v2091_v0 = vpack.c.bf16 %v1905_v39, %v1905_v39  ;;  %v1197_v41 = vand.u32 15, %v829_v27  ;;  %v457_v47 = vpack.c.bf16 %v425_v35, %v425_v35  ;;  %v428_v35 = vld [vmem:[%s3975_s26 + $0xc8] sm:$0xff] }
  0xcb   : > { %v754_v46 = vadd.f32 %v4021_v6, %v714_v38  ;;  %3500 = vmatmul.msk.bf16.gmra.mxu0 %vm555_vm0, %v540_v34  ;;  %v458_v48 = vpack.c.bf16 %v426_v36, %v426_v36 }
  0xcc   : > { %v4066_v51 = vunpack.c.l.b16 %v2020_v45  ;;  %v4079_v17 = vunpack.c.l.b16 %v2091_v0  ;;  %vm1589_vm7 = vcmp.eq.s32.totalorder %v1197_v41, 0 }
  0xcd   : > { %v790_v52 = vmax.f32 %v754_v46, 0.0 }
  0xce   : > { %5257 = vst [vmem:[#allocation17_spill] sm:$0xff] %v4066_v51 }
  0xcf   : > { %v1623_v55 = vrot.slane %v790_v52, 7  ;;  %v1840_v56 = vrot.slane %v790_v52, 1  ;;  %v2057_v13 = vpack.c.bf16 %v790_v52, %v790_v52 }
  0xd0   : > { %v628_v59 = vpop.f32.mrf.mxu0 }
  0xd1   : > { %v715_v60 = vmul.f32 %v4014_v4, %v628_v59  ;;  %v1904_v61 = vsel %vm1872_vm3, %v1839_v33, %v1840_v56  ;;  %v1687_v62 = vsel %vm1655_vm1, %v1622_v32, %v1623_v55  ;;  %v4089_v30 = vunpack.c.l.b16 %v2057_v13 }
  0xd2   : > { %v1984_v63 = vsel %vm1803_vm4, 0.0, %v1904_v61  ;;  %v1768_v11 = vsel %vm1587_vm5, 0.0, %v1687_v62  ;;  %v522_v61 = vunpack.c.l.b16 %v458_v48 }
  0xd3   : > { %v755_v2 = vadd.f32 %v4021_v6, %v715_v60  ;;  %v2092_v8 = vpack.c.bf16 %v1984_v63, %v1984_v63  ;;  %v2021_v24 = vpack.c.bf16 %v1768_v11, %v1768_v11  ;;  %v521_v60 = vunpack.c.l.b16 %v457_v47 }
  0xd5   : > { %v791_v9 = vmax.f32 %v755_v2, 0.0  ;;  %v4076_v10 = vunpack.c.l.b16 %v2092_v8  ;;  %v4099_v38 = vunpack.c.l.b16 %v2021_v24  ;;  %v830_v8 = vadd.s32 56, %v4016_v5 }
  0xd6   : > { %v542_v12 = vpack.c.b16 %v522_v61, %v521_v60 }
  0xd7   : > { %v1624_v18 = vrot.slane %v791_v9, 7  ;;  %v1841_v19 = vrot.slane %v791_v9, 1  ;;  %v2058_v22 = vpack.c.bf16 %v791_v9, %v791_v9  ;;  %5258 = vst [vmem:[#allocation18_spill] sm:$0xff] %v4099_v38 }
  0xd8   : > { %v631_v21 = vpop.f32.mrf.mxu0 }
  0xd9   : > { %v716_v25 = vmul.f32 %v4014_v4, %v631_v21  ;;  %v1903_v26 = vsel %vm1872_vm3, %v1840_v56, %v1841_v19  ;;  %v1686_v28 = vsel %vm1655_vm1, %v1623_v55, %v1624_v18  ;;  %v4091_v32 = vunpack.c.l.b16 %v2058_v22 }
  0xda   : > { %v2022_v33 = vpack.c.bf16 %v1686_v28, %v1686_v28  ;;  %v2093_v58 = vpack.c.bf16 %v1903_v26, %v1903_v26  ;;  %v1204_v28 = vand.u32 15, %v830_v8 }
  0xdb   : > { %v756_v34 = vadd.f32 %v4021_v6, %v716_v25  ;;  %3501 = vmatmul.msk.bf16.gmra.mxu0 %vm555_vm0, %v541_v20  ;;  %v831_v25 = vadd.s32 64, %v4016_v5 }
  0xdc   : > { %v4101_v39 = vunpack.c.l.b16 %v2022_v33  ;;  %v4113_v3 = vunpack.c.l.b16 %v2093_v58  ;;  %vm1807_vm8 = vcmp.eq.s32.totalorder %v1204_v28, 15 }
  0xdd   : > { %v792_v40 = vmax.f32 %v756_v34, 0.0  ;;  %v427_v34 = vld [vmem:[%s3975_s26 + $0xc0] sm:$0xff]  ;;  %v1211_v47 = vand.u32 15, %v831_v25 }
  0xde   : > { %5259 = vst [vmem:[#allocation19_spill] sm:$0xff] %v4101_v39 }
  0xdf   : > { %v1625_v45 = vrot.slane %v792_v40, 7  ;;  %v1842_v46 = vrot.slane %v792_v40, 1  ;;  %v2059_v7 = vpack.c.bf16 %v792_v40, %v792_v40  ;;  %vm1591_vm9 = vcmp.eq.s32.totalorder %v1211_v47, 0 }
  0xe0   : > { %v633_v52 = vpop.f32.mrf.mxu0 }
  0xe1   : > { %v717_v53 = vmul.f32 %v4014_v4, %v633_v52  ;;  %v1902_v55 = vsel %vm1872_vm3, %v1841_v19, %v1842_v46  ;;  %v1685_v56 = vsel %vm1655_vm1, %v1624_v18, %v1625_v45  ;;  %v4124_v26 = vunpack.c.l.b16 %v2059_v7 }
  0xe2   : > { %v1986_v57 = vsel %vm1805_vm6, 0.0, %v1902_v55  ;;  %v1770_v2 = vsel %vm1589_vm7, 0.0, %v1685_v56  ;;  %v460_v55 = vpack.c.bf16 %v428_v35, %v428_v35 }
  0xe3   : > { %v757_v59 = vadd.f32 %v4021_v6, %v717_v53  ;;  %v2094_v62 = vpack.c.bf16 %v1986_v57, %v1986_v57  ;;  %v2023_v20 = vpack.c.bf16 %v1770_v2, %v1770_v2  ;;  %v459_v53 = vpack.c.bf16 %v427_v34, %v427_v34 }
  0xe4   : > { %v524_v2 = vunpack.c.l.b16 %v460_v55 }
  0xe5   : > { %v793_v63 = vmax.f32 %v757_v59, 0.0  ;;  %v4111_v0 = vunpack.c.l.b16 %v2094_v62  ;;  %v4134_v40 = vunpack.c.l.b16 %v2023_v20 }
  0xe7   : > { %v1626_v9 = vrot.slane %v793_v63, 7  ;;  %v1843_v11 = vrot.slane %v793_v63, 1  ;;  %v2060_v19 = vpack.c.bf16 %v793_v63, %v793_v63  ;;  %5260 = vst [vmem:[#allocation20_spill] sm:$0xff] %v4134_v40  ;;  %v523_v63 = vunpack.c.l.b16 %v459_v53 }
  0xe8   : > { %v636_v13 = vpop.f32.mrf.mxu0 }
  0xe9   : > { %v718_v21 = vmul.f32 %v4014_v4, %v636_v13  ;;  %v1901_v22 = vsel %vm1872_vm3, %v1842_v46, %v1843_v11  ;;  %v1684_v24 = vsel %vm1655_vm1, %v1625_v45, %v1626_v9  ;;  %v4126_v27 = vunpack.c.l.b16 %v2060_v19 }
  0xea   : > { %v2024_v29 = vpack.c.bf16 %v1684_v24, %v1684_v24  ;;  %v2095_v61 = vpack.c.bf16 %v1901_v22, %v1901_v22  ;;  %v832_v19 = vadd.s32 72, %v4016_v5 }
  0xeb   : > { %v758_v33 = vadd.f32 %v4021_v6, %v718_v21  ;;  %3502 = vmatmul.msk.bf16.gmra.mxu0 %vm555_vm0, %v542_v12 }
  0xec   : > { %v4136_v41 = vunpack.c.l.b16 %v2024_v29  ;;  %v4149_v20 = vunpack.c.l.b16 %v2095_v61  ;;  %v1218_v47 = vand.u32 15, %v832_v19 }
  0xed   : > { %v794_v45 = vmax.f32 %v758_v33, 0.0 }
  0xee   : > { %5261 = vst [vmem:[#allocation21_spill] sm:$0xff] %v4136_v41  ;;  %vm1809_vm10 = vcmp.eq.s32.totalorder %v1218_v47, 15 }
  0xef   : > { %v1627_v48 = vrot.slane %v794_v45, 7  ;;  %v1844_v52 = vrot.slane %v794_v45, 1 }
  0xf0   : > { %v638_v56 = vpop.f32.mrf.mxu0 }
  0xf1   : > { %v719_v57 = vmul.f32 %v4014_v4, %v638_v56  ;;  %v1900_v58 = vsel %vm1872_vm3, %v1843_v11, %v1844_v52  ;;  %v1683_v59 = vsel %vm1655_vm1, %v1626_v9, %v1627_v48  ;;  %v2061_v11 = vpack.c.bf16 %v794_v45, %v794_v45 }
  0xf2   : > { %v1988_v60 = vsel %vm1807_vm8, 0.0, %v1900_v58  ;;  %v1772_v13 = vsel %vm1591_vm9, 0.0, %v1683_v59  ;;  %v543_v9 = vpack.c.b16 %v524_v2, %v523_v63  ;;  %v833_v45 = vadd.s32 80, %v4016_v5  ;;  %v429_v58 = vld [vmem:[%s3975_s26 + $0xd0] sm:$0xff]  ;;  %v430_v59 = vld [vmem:[%s3975_s26 + $0xd8] sm:$0xff] }
  0xf3   : > { %v759_v62 = vadd.f32 %v4021_v6, %v719_v57  ;;  %v2096_v7 = vpack.c.bf16 %v1988_v60, %v1988_v60  ;;  %v2025_v29 = vpack.c.bf16 %v1772_v13, %v1772_v13  ;;  %v4159_v53 = vunpack.c.l.b16 %v2061_v11 }
  0xf4   : > { %v1225_v63 = vand.u32 15, %v833_v45  ;;  %v462_v13 = vpack.c.bf16 %v430_v59, %v430_v59 }
  0xf5   : > { %v795_v8 = vmax.f32 %v759_v62, 0.0  ;;  %v4146_v12 = vunpack.c.l.b16 %v2096_v7  ;;  %v4169_v60 = vunpack.c.l.b16 %v2025_v29 }
  0xf6   : > { %vm1593_vm11 = vcmp.eq.s32.totalorder %v1225_v63, 0  ;;  %v526_v45 = vunpack.c.l.b16 %v462_v13 }
  0xf7   : > { %v1628_v21 = vrot.slane %v795_v8, 7  ;;  %v1845_v24 = vrot.slane %v795_v8, 1  ;;  %v2062_v28 = vpack.c.bf16 %v795_v8, %v795_v8  ;;  %5262 = vst [vmem:[#allocation22_spill] sm:$0xff] %v4169_v60  ;;  %v461_v8 = vpack.c.bf16 %v429_v58, %v429_v58 }
  0xf8   : > { %v641_v22 = vpop.f32.mrf.mxu0 }
  0xf9   : > { %v720_v33 = vmul.f32 %v4014_v4, %v641_v22  ;;  %v1899_v34 = vsel %vm1872_vm3, %v1844_v52, %v1845_v24  ;;  %v1682_v35 = vsel %vm1655_vm1, %v1627_v48, %v1628_v21  ;;  %v4161_v55 = vunpack.c.l.b16 %v2062_v28 }
  0xfa   : > { %v2026_v56 = vpack.c.bf16 %v1682_v35, %v1682_v35  ;;  %v2097_v29 = vpack.c.bf16 %v1899_v34, %v1899_v34  ;;  %v525_v35 = vunpack.c.l.b16 %v461_v8 }
  0xfb   : > { %v760_v57 = vadd.f32 %v4021_v6, %v720_v33  ;;  %3503 = vmatmul.msk.bf16.gmra.mxu0 %vm555_vm0, %v543_v9 }
  0xfc   : > { %v4171_v48 = vunpack.c.l.b16 %v2026_v56  ;;  %v4183_v59 = vunpack.c.l.b16 %v2097_v29 }
  0xfd   : > { %v796_v61 = vmax.f32 %v760_v57, 0.0 }
  0xfe   : > { %5263 = vst [vmem:[#allocation23_spill] sm:$0xff] %v4171_v48 }
  0xff   : > { %v1629_v2 = vrot.slane %v796_v61, 7  ;;  %v1846_v7 = vrot.slane %v796_v61, 1 }
 0x100   : > { %v643_v19 = vpop.f32.mrf.mxu0 }
 0x101   : > { %v721_v11 = vmul.f32 %v4014_v4, %v643_v19  ;;  %v1898_v9 = vsel %vm1872_vm3, %v1845_v24, %v1846_v7  ;;  %v1681_v22 = vsel %vm1655_vm1, %v1628_v21, %v1629_v2  ;;  %v2063_v19 = vpack.c.bf16 %v796_v61, %v796_v61 }
 0x102   : > { %v1990_v28 = vsel %vm1809_vm10, 0.0, %v1898_v9  ;;  %v1774_v58 = vsel %vm1593_vm11, 0.0, %v1681_v22  ;;  %v834_v24 = vadd.s32 88, %v4016_v5  ;;  %v544_v21 = vpack.c.b16 %v526_v45, %v525_v35 }
 0x103   : > { %v761_v33 = vadd.f32 %v4021_v6, %v721_v11  ;;  %v2098_v47 = vpack.c.bf16 %v1990_v28, %v1990_v28  ;;  %v2027_v13 = vpack.c.bf16 %v1774_v58, %v1774_v58  ;;  %v835_v61 = vadd.s32 96, %v4016_v5 }
 0x104   : > { %v4194_v28 = vunpack.c.l.b16 %v2063_v19 }
 0x105   : > { %v797_v56 = vmax.f32 %v761_v33, 0.0  ;;  %v4181_v57 = vunpack.c.l.b16 %v2098_v47  ;;  %v1232_v33 = vand.u32 15, %v834_v24  ;;  %v431_v47 = vld [vmem:[%s3975_s26 + $0xe0] sm:$0xff]  ;;  %v4204_v58 = vunpack.c.l.b16 %v2027_v13 }
 0x106   : > { %v1239_v19 = vand.u32 15, %v835_v61 }
 0x107   : > { %v1630_v62 = vrot.slane %v797_v56, 7  ;;  %v1847_v46 = vrot.slane %v797_v56, 1  ;;  %v2064_v8 = vpack.c.bf16 %v797_v56, %v797_v56  ;;  %v432_v56 = vld [vmem:[%s3975_s26 + $0xe8] sm:$0xff]  ;;  %5264 = vst [vmem:[#allocation24_spill] sm:$0xff] %v4204_v58  ;;  %vm1811_vm12 = vcmp.eq.s32.totalorder %v1232_v33, 15 }
 0x108   : > { %v646_v34 = vpop.f32.mrf.mxu0  ;;  %vm1595_vm13 = vcmp.eq.s32.totalorder %v1239_v19, 0  ;;  %v3511_v19 = vld [vmem:[%s5207_s5 + $0x8] sm:$0xf] }
 0x109   : > { %v722_v11 = vmul.f32 %v4014_v4, %v646_v34  ;;  %v1897_v9 = vsel %vm1872_vm3, %v1846_v7, %v1847_v46  ;;  %v1680_v22 = vsel %vm1655_vm1, %v1629_v2, %v1630_v62  ;;  %v4196_v29 = vunpack.c.l.b16 %v2064_v8 }
 0x10a   : > { %v2028_v35 = vpack.c.bf16 %v1680_v22, %v1680_v22  ;;  %v464_v22 = vpack.c.bf16 %v432_v56, %v432_v56 }
 0x10b   : > { %v762_v45 = vadd.f32 %v4021_v6, %v722_v11  ;;  %3504 = vmatmul.msk.bf16.gmra.mxu0 %vm555_vm0, %v544_v21  ;;  %v463_v11 = vpack.c.bf16 %v431_v47, %v431_v47 }
 0x10c   : > { %v4206_v34 = vunpack.c.l.b16 %v2028_v35  ;;  %v2099_v35 = vpack.c.bf16 %v1897_v9, %v1897_v9  ;;  %v528_v7 = vunpack.c.l.b16 %v464_v22  ;;  %v836_v22 = vadd.s32 104, %v4016_v5 }
 0x10d   : > { %v4208_v2 = vmax.f32 %v762_v45, 0.0  ;;  %v527_v24 = vunpack.c.l.b16 %v463_v11 }
 0x10e   : > { %5265 = vst [vmem:[#allocation25_spill] sm:$0xff] %v4206_v34  ;;  %v4222_v47 = vunpack.c.l.b16 %v2099_v35 }
 0x10f   : > { %v1631_v8 = vrot.slane %v4208_v2, 7  ;;  %v1848_v21 = vrot.slane %v4208_v2, 1  ;;  %v545_v9 = vpack.c.b16 %v528_v7, %v527_v24 }
 0x110   : > { %v648_v54 = vpop.f32.mrf.mxu0 }
 0x111   : > { %v723_v44 = vmul.f32 %v4014_v4, %v648_v54  ;;  %v1896_v13 = vsel %vm1872_vm3, %v1847_v46, %v1848_v21  ;;  %v1679_v61 = vsel %vm1655_vm1, %v1630_v62, %v1631_v8 }
 0x112   : > { %v1992_v45 = vsel %vm1811_vm12, 0.0, %v1896_v13  ;;  %v1776_v54 = vsel %vm1595_vm13, 0.0, %v1679_v61 }
 0x113   : > { %v763_v33 = vadd.f32 %v4021_v6, %v723_v44  ;;  %v2100_v52 = vpack.c.bf16 %v1992_v45, %v1992_v45  ;;  %v3597_v44 = vld [vmem:[%s5207_s5 + $0x8] sm:$0x30]  ;;  %v2029_v13 = vpack.c.bf16 %v1776_v54, %v1776_v54  ;;  %v837_v45 = vadd.s32 112, %v4016_v5 }
 0x114   : > { %v1246_v54 = vand.u32 15, %v836_v22 }
 0x115   : > { %v4220_v25 = vmax.f32 %v763_v33, 0.0  ;;  %v4224_v56 = vunpack.c.l.b16 %v2100_v52  ;;  %v3512_v52 = vor.u32 %v3597_v44, %v3511_v19  ;;  %v433_v19 = vld [vmem:[%s3975_s26 + $0xf0] sm:$0xff]  ;;  %v434_v44 = vld [vmem:[%s3975_s26 + $0xf8] sm:$0xff] }
 0x116   : > { %v465_v63 = vpack.c.bf16 %v433_v19, %v433_v19  ;;  %vm1813_vm15 = vcmp.eq.s32.totalorder %v1246_v54, 15 }
 0x117   : > { %v1632_v46 = vrot.slane %v4220_v25, 7  ;;  %v2604_v35 = vsel %vm2602_vm14, %v3512_v52, 0  ;;  %v1849_v33 = vrot.slane %v4220_v25, 1 }
 0x118   : > { %v651_v11 = vpop.f32.mrf.mxu0  ;;  %3601 = vmatpush.bf16.msra.mxu2 %v2604_v35  ;;  %2613 = vmatpush.bf16.msrb.mxu0 %v2604_v35 }
 0x119   : > { %v724_v7 = vmul.f32 %v4014_v4, %v651_v11  ;;  %v1678_v24 = vsel %vm1655_vm1, %v1631_v8, %v1632_v46  ;;  %3602 = vmatpush.bf16.msra.mxu3 %v2604_v35  ;;  %v4246_v11 = vunpack.c.l.b16 %v2029_v13  ;;  %3600 = vmatpush.bf16.msra.mxu1 %v2604_v35  ;;  %v1895_v36 = vsel %vm1872_vm3, %v1848_v21, %v1849_v33 }
 0x11a   : > { %v2030_v61 = vpack.c.bf16 %v1678_v24, %v1678_v24  ;;  %v1253_v24 = vand.u32 15, %v837_v45  ;;  %v2101_v35 = vpack.c.bf16 %v1895_v36, %v1895_v36 }
 0x11b   : > { %v764_v62 = vadd.f32 %v4021_v6, %v724_v7  ;;  %3505 = vmatmul.msk.bf16.gmra.mxu0 %vm555_vm0, %v545_v9  ;;  %5266 = vst [vmem:[#allocation26_spill] sm:$0xff] %v4246_v11  ;;  %v466_v9 = vpack.c.bf16 %v434_v44, %v434_v44 }
 0x11c   : > { %v4248_v8 = vunpack.c.l.b16 %v2030_v61  ;;  %vm1597_vm2 = vcmp.eq.s32.totalorder %v1253_v24, 0  ;;  %v529_v61 = vunpack.c.l.b16 %v465_v63  ;;  %v4260_v54 = vunpack.c.l.b16 %v2101_v35 }
 0x11d   : > { %v800_v52 = vmax.f32 %v764_v62, 0.0  ;;  %v530_v19 = vunpack.c.l.b16 %v466_v9 }
 0x11e   : > { %5267 = vst [vmem:[#allocation27_spill] sm:$0xff] %v4248_v8 }
 0x11f   : > { %v1633_v7 = vrot.slane %v800_v52, 7  ;;  %v1850_v49 = vrot.slane %v800_v52, 1  ;;  %v2067_v23 = vpack.c.bf16 %v800_v52, %v800_v52  ;;  %5268 = vst [vmem:[#allocation28_spill] sm:$0xff] %v4260_v54  ;;  %v546_v15 = vpack.c.b16 %v530_v19, %v529_v61 }
 0x120   : > { %v653_v37 = vpop.f32.mrf.mxu0 }
 0x121   : > { %v725_v22 = vmul.f32 %v4014_v4, %v653_v37  ;;  %v1677_v62 = vsel %vm1655_vm1, %v1632_v46, %v1633_v7  ;;  %v1894_v13 = vsel %vm1872_vm3, %v1849_v33, %v1850_v49  ;;  %v2265_v36 = vunpack.c.l.b16 %v2067_v23 }
 0x122   : > { %v1994_v44 = vsel %vm1813_vm15, 0.0, %v1894_v13  ;;  %v1778_v31 = vsel %vm1597_vm2, 0.0, %v1677_v62  ;;  %v1260_v23 = vand.u32 15, %v838_v1 }
 0x123   : > { %v765_v45 = vadd.f32 %v4021_v6, %v725_v22  ;;  %v2102_v18 = vpack.c.bf16 %v1994_v44, %v1994_v44  ;;  %v2031_v11 = vpack.c.bf16 %v1778_v31, %v1778_v31 }
 0x124   : > { %vm1815_vm4 = vcmp.eq.s32.totalorder %v1260_v23, 15 }
 0x125   : > { %v801_v21 = vmax.f32 %v765_v45, 0.0  ;;  %v4262_v37 = vunpack.c.l.b16 %v2102_v18  ;;  %v839_v18 = vadd.s32 128, %v4016_v5  ;;  %v4273_v31 = vunpack.c.l.b16 %v2031_v11 }
 0x127   : > { %5269 = vst [vmem:[#allocation29_spill] sm:$0xff] %v4262_v37  ;;  %v1634_v24 = vrot.slane %v801_v21, 7  ;;  %v2068_v46 = vpack.c.bf16 %v801_v21, %v801_v21  ;;  %v1851_v9 = vrot.slane %v801_v21, 1  ;;  %v1267_v44 = vand.u32 15, %v839_v18 }
 0x128   : > { %v656_v33 = vpop.f32.mrf.mxu0 }
 0x129   : > { %v726_v52 = vmul.f32 %v4014_v4, %v656_v33  ;;  %v2266_v22 = vunpack.c.l.b16 %v2068_v46  ;;  %v1676_v62 = vsel %vm1655_vm1, %v1633_v7, %v1634_v24  ;;  %v1893_v7 = vsel %vm1872_vm3, %v1850_v49, %v1851_v9 }
 0x12a   : > { %v2032_v13 = vpack.c.bf16 %v1676_v62, %v1676_v62  ;;  %v2103_v1 = vpack.c.bf16 %v1893_v7, %v1893_v7  ;;  %vm1599_vm5 = vcmp.eq.s32.totalorder %v1267_v44, 0 }
 0x12b   : > { %v766_v35 = vadd.f32 %v4021_v6, %v726_v52  ;;  %3506 = vmatmul.msk.bf16.gmra.mxu0 %vm555_vm0, %v546_v15  ;;  %v2294_v45 = vpack.c.b16 %v2266_v22, %v2265_v36 }
 0x12c   : > { %v4275_v61 = vunpack.c.l.b16 %v2032_v13  ;;  %v2391_v18 = vunpack.c.l.b16 %v2103_v1 }
 0x12d   : > { %v802_v19 = vmax.f32 %v766_v35, 0.0  ;;  %2319 = vrot.lane.b32.xlu0 %v2294_v45, %s3831_s25 }
 0x12f   : > { %v1635_v46 = vrot.slane %v802_v19, 7  ;;  %v1852_v33 = vrot.slane %v802_v19, 1  ;;  %v2069_v45 = vpack.c.bf16 %v802_v19, %v802_v19 }
 0x130   : > { %v658_v15 = vpop.f32.mrf.mxu0 }
 0x131   : > { %v727_v11 = vmul.f32 %v4014_v4, %v658_v15  ;;  %v1892_v36 = vsel %vm1872_vm3, %v1851_v9, %v1852_v33  ;;  %v1675_v22 = vsel %vm1655_vm1, %v1634_v24, %v1635_v46  ;;  %v840_v15 = vadd.s32 136, %v4016_v5 }
 0x132   : > { %v1996_v52 = vsel %vm1815_vm4, 0.0, %v1892_v36  ;;  %v1780_v23 = vsel %vm1599_vm5, 0.0, %v1675_v22  ;;  %v2267_v24 = vunpack.c.l.b16 %v2069_v45 }
 0x133   : > { %v767_v49 = vadd.f32 %v4021_v6, %v727_v11  ;;  %v2104_v62 = vpack.c.bf16 %v1996_v52, %v1996_v52  ;;  %v2033_v9 = vpack.c.bf16 %v1780_v23, %v1780_v23  ;;  %v841_v52 = vadd.s32 144, %v4016_v5 }
 0x135   : > { %v803_v13 = vmax.f32 %v767_v49, 0.0  ;;  %v2392_v35 = vunpack.c.l.b16 %v2104_v62  ;;  %v1274_v62 = vand.u32 15, %v840_v15 }
 0x137   : > { %v1636_v63 = vrot.slane %v803_v13, 7  ;;  %v2420_v7 = vpack.c.b16 %v2392_v35, %v2391_v18  ;;  %v2070_v21 = vpack.c.bf16 %v803_v13, %v803_v13  ;;  %v1853_v36 = vrot.slane %v803_v13, 1 }
 0x138   : > { %v661_v8 = vpop.f32.mrf.mxu0  ;;  %v5270_v18 = vmov 0   ;;  %v4296_v35 = vunpack.c.l.b16 %v2033_v9  ;;  %v1281_v13 = vand.u32 15, %v841_v52  ;;  %vm1817_vm6 = vcmp.eq.s32.totalorder %v1274_v62, 15 }
 0x139   : > { %v728_v44 = vmul.f32 %v4014_v4, %v661_v8  ;;  %2445 = vrot.lane.b32.xlu0 %v2420_v7, %s3832_s13  ;;  %v2268_v11 = vunpack.c.l.b16 %v2070_v21  ;;  %v1674_v1 = vsel %vm1655_vm1, %v1635_v46, %v1636_v63  ;;  %v1891_v21 = vsel %vm1872_vm3, %v1852_v33, %v1853_v36 }
 0x13a   : > { %v2034_v19 = vpack.c.bf16 %v1674_v1, %v1674_v1  ;;  %vm1601_vm7 = vcmp.eq.s32.totalorder %v1281_v13, 0  ;;  %v842_v62 = vadd.s32 152, %v4016_v5 }
 0x13b   : > { %v768_v22 = vadd.f32 %v4021_v6, %v728_v44  ;;  %v2295_v49 = vpack.c.b16 %v2268_v11, %v2267_v24  ;;  %700 = vmatmul.bf16.gmra.mxu0 %v5270_v18  ;;  %v2105_v24 = vpack.c.bf16 %v1891_v21, %v1891_v21 }
 0x13c   : > { %v4298_v8 = vunpack.c.l.b16 %v2034_v19 }
 0x13d   : > { %v804_v23 = vmax.f32 %v768_v22, 0.0  ;;  %2321 = vrot.lane.b32.xlu2 %v2295_v49, %s3831_s25  ;;  %v2393_v52 = vunpack.c.l.b16 %v2105_v24  ;;  %v843_v24 = vadd.s32 160, %v4016_v5 }
 0x13f   : > { %v1637_v45 = vrot.slane %v804_v23, 7  ;;  %v1854_v7 = vrot.slane %v804_v23, 1 }
 0x140   : > { %v663_v15 = vpop.f32.mrf.mxu0 }
 0x141   : > { %v729_v44 = vmul.f32 %v4014_v4, %v663_v15  ;;  %v1890_v9 = vsel %vm1872_vm3, %v1853_v36, %v1854_v7  ;;  %v1673_v11 = vsel %vm1655_vm1, %v1636_v63, %v1637_v45  ;;  %v2071_v63 = vpack.c.bf16 %v804_v23, %v804_v23 }
 0x142   : > { %v1998_v1 = vsel %vm1817_vm6, 0.0, %v1890_v9  ;;  %v1782_v18 = vsel %vm1601_vm7, 0.0, %v1673_v11 }
 0x143   : > { %v769_v33 = vadd.f32 %v4021_v6, %v729_v44  ;;  %v2106_v19 = vpack.c.bf16 %v1998_v1, %v1998_v1  ;;  %v2035_v21 = vpack.c.bf16 %v1782_v18, %v1782_v18 }
 0x145   : > { %v805_v22 = vmax.f32 %v769_v33, 0.0  ;;  %v2394_v49 = vunpack.c.l.b16 %v2106_v19  ;;  %v1288_v33 = vand.u32 15, %v842_v62  ;;  %v4320_v19 = vunpack.c.l.b16 %v2035_v21 }
 0x147   : > { %v1638_v46 = vrot.slane %v805_v22, 7  ;;  %v1855_v15 = vrot.slane %v805_v22, 1  ;;  %v2421_v58 = vpack.c.b16 %v2394_v49, %v2393_v52  ;;  %v2072_v34 = vpack.c.bf16 %v805_v22, %v805_v22  ;;  %5271 = vst [vmem:[#allocation30_spill] sm:$0xff] %v4320_v19 }
 0x148   : > { %v666_v36 = vpop.f32.mrf.mxu0  ;;  %vm1819_vm8 = vcmp.eq.s32.totalorder %v1288_v33, 15 }
 0x149   : > { %v730_v60 = vmul.f32 %v4014_v4, %v666_v36  ;;  %2447 = vrot.lane.b32.xlu2 %v2421_v58, %s3832_s13  ;;  %v1889_v13 = vsel %vm1872_vm3, %v1854_v7, %v1855_v15  ;;  %v1672_v44 = vsel %vm1655_vm1, %v1637_v45, %v1638_v46  ;;  %v2270_v1 = vunpack.c.l.b16 %v2072_v34 }
 0x14a   : > { %v2036_v9 = vpack.c.bf16 %v1672_v44, %v1672_v44  ;;  %v2269_v58 = vunpack.c.l.b16 %v2071_v63  ;;  %v1295_v7 = vand.u32 15, %v843_v24  ;;  %v2107_v36 = vpack.c.bf16 %v1889_v13, %v1889_v13 }
 0x14b   : > { %v770_v11 = vadd.f32 %v4021_v6, %v730_v60  ;;  %v844_v13 = vadd.s32 168, %v4016_v5 }
 0x14c   : > { %v4322_v22 = vunpack.c.l.b16 %v2036_v9  ;;  %v2296_v18 = vpack.c.b16 %v2270_v1, %v2269_v58  ;;  %vm1603_vm9 = vcmp.eq.s32.totalorder %v1295_v7, 0 }
 0x14d   : > { %v4324_v52 = vmax.f32 %v770_v11, 0.0  ;;  %v4339_v11 = vunpack.c.l.b16 %v2107_v36  ;;  %v845_v36 = vadd.s32 176, %v4016_v5 }
 0x14e   : > { %5272 = vst [vmem:[#allocation31_spill] sm:$0xff] %v4322_v22 }
 0x14f   : > { %v1639_v45 = vrot.slane %v4324_v52, 7  ;;  %v1856_v49 = vrot.slane %v4324_v52, 1 }
 0x150   : > { %v668_v60 = vpop.f32.mrf.mxu0 }
 0x151   : > { %v731_v34 = vmul.f32 %v4014_v4, %v668_v60  ;;  %2323 = vrot.lane.b32.xlu2 %v2296_v18, %s3831_s25  ;;  %v1888_v62 = vsel %vm1872_vm3, %v1855_v15, %v1856_v49  ;;  %v1671_v21 = vsel %vm1655_vm1, %v1638_v46, %v1639_v45 }
 0x152   : > { %v2000_v63 = vsel %vm1819_vm8, 0.0, %v1888_v62  ;;  %v1784_v33 = vsel %vm1603_vm9, 0.0, %v1671_v21  ;;  %vm2467_vm8 = vcmask 31744   ;;  %vm2522_vm9 = vcmask 64512  }
 0x153   : > { %v771_v44 = vadd.f32 %v4021_v6, %v731_v34  ;;  %v2108_v9 = vpack.c.bf16 %v2000_v63, %v2000_v63  ;;  %v2037_v18 = vpack.c.bf16 %v1784_v33, %v1784_v33  ;;  %v1302_v63 = vand.u32 15, %v844_v13 }
 0x155   : > { %v4337_v24 = vmax.f32 %v771_v44, 0.0  ;;  %v4341_v1 = vunpack.c.l.b16 %v2108_v9  ;;  %v4353_v44 = vunpack.c.l.b16 %v2037_v18  ;;  %vm1821_vm10 = vcmp.eq.s32.totalorder %v1302_v63, 15 }
 0x157   : > { %v1640_v58 = vrot.slane %v4337_v24, 7  ;;  %v1857_v34 = vrot.slane %v4337_v24, 1  ;;  %5273 = vst [vmem:[#allocation32_spill] sm:$0xff] %v4353_v44 }
 0x158   : > { %v671_v46 = vpop.f32.mrf.mxu0 }
 0x159   : > { %v732_v7 = vmul.f32 %v4014_v4, %v671_v46  ;;  %v1670_v60 = vsel %vm1655_vm1, %v1639_v45, %v1640_v58  ;;  %v1887_v33 = vsel %vm1872_vm3, %v1856_v49, %v1857_v34  ;;  %v1309_v45 = vand.u32 15, %v845_v36 }
 0x15a   : > { %v2038_v62 = vpack.c.bf16 %v1670_v60, %v1670_v60  ;;  %v2109_v18 = vpack.c.bf16 %v1887_v33, %v1887_v33 }
 0x15b   : > { %v772_v21 = vadd.f32 %v4021_v6, %v732_v7  ;;  %vm1605_vm11 = vcmp.eq.s32.totalorder %v1309_v45, 0 }
 0x15c   : > { %v4355_v9 = vunpack.c.l.b16 %v2038_v62  ;;  %v4367_v41 = vunpack.c.l.b16 %v2109_v18 }
 0x15d   : > { %v808_v23 = vmax.f32 %v772_v21, 0.0 }
 0x15e   : > { %5274 = vst [vmem:[#allocation33_spill] sm:$0xff] %v4355_v9 }
 0x15f   : > { %v1641_v15 = vrot.slane %v808_v23, 7  ;;  %v1858_v48 = vrot.slane %v808_v23, 1  ;;  %v2075_v46 = vpack.c.bf16 %v808_v23, %v808_v23 }
 0x160   : > { %v673_v60 = vpop.f32.mrf.mxu0 }
 0x161   : > { %v733_v40 = vmul.f32 %v4014_v4, %v673_v60  ;;  %v1886_v13 = vsel %vm1872_vm3, %v1857_v34, %v1858_v48  ;;  %v1669_v62 = vsel %vm1655_vm1, %v1640_v58, %v1641_v15  ;;  %v846_v60 = vadd.s32 184, %v4016_v5 }
 0x162   : > { %v2002_v7 = vsel %vm1821_vm10, 0.0, %v1886_v13  ;;  %v1786_v50 = vsel %vm1605_vm11, 0.0, %v1669_v62  ;;  %v4374_v58 = vunpack.c.l.b16 %v2075_v46  ;;  %vm2569_vm10 = vcmask 97280  }
 0x163   : > { %v773_v49 = vadd.f32 %v4021_v6, %v733_v40  ;;  %v2110_v21 = vpack.c.bf16 %v2002_v7, %v2002_v7  ;;  %v2039_v40 = vpack.c.bf16 %v1786_v50, %v1786_v50 }
 0x165   : > { %v809_v36 = vmax.f32 %v773_v49, 0.0  ;;  %v4369_v63 = vunpack.c.l.b16 %v2110_v21  ;;  %v847_v49 = vadd.s32 192, %v4016_v5  ;;  %v4387_v50 = vunpack.c.l.b16 %v2039_v40 }
 0x167   : > { %v1642_v51 = vrot.slane %v809_v36, 7  ;;  %v1859_v34 = vrot.slane %v809_v36, 1  ;;  %v2076_v45 = vpack.c.bf16 %v809_v36, %v809_v36  ;;  %v1316_v36 = vand.u32 15, %v846_v60  ;;  %5275 = vst [vmem:[#allocation34_spill] sm:$0xff] %v4387_v50 }
 0x168   : > { %v676_v13 = vpop.f32.mrf.mxu0  ;;  %v1323_v38 = vand.u32 15, %v847_v49 }
 0x169   : > { %v734_v23 = vmul.f32 %v4014_v4, %v676_v13  ;;  %v4377_v7 = vunpack.c.l.b16 %v2076_v45  ;;  %v1885_v18 = vsel %vm1872_vm3, %v1858_v48, %v1859_v34  ;;  %v1668_v62 = vsel %vm1655_vm1, %v1641_v15, %v1642_v51 }
 0x16a   : > { %v2040_v21 = vpack.c.bf16 %v1668_v62, %v1668_v62  ;;  %vm1823_vm12 = vcmp.eq.s32.totalorder %v1316_v36, 15  ;;  %vm1607_vm13 = vcmp.eq.s32.totalorder %v1323_v38, 0 }
 0x16b   : > { %v774_v33 = vadd.f32 %v4021_v6, %v734_v23 }
 0x16c   : > { %v4389_v13 = vunpack.c.l.b16 %v2040_v21  ;;  %v2111_v21 = vpack.c.bf16 %v1885_v18, %v1885_v18 }
 0x16d   : > { %v810_v45 = vmax.f32 %v774_v33, 0.0 }
 0x16e   : > { %5276 = vst [vmem:[#allocation35_spill] sm:$0xff] %v4389_v13  ;;  %v4401_v13 = vunpack.c.l.b16 %v2111_v21 }
 0x16f   : > { %v1643_v39 = vrot.slane %v810_v45, 7  ;;  %v1860_v15 = vrot.slane %v810_v45, 1  ;;  %v2077_v46 = vpack.c.bf16 %v810_v45, %v810_v45 }
 0x170   : > { %v678_v16 = vpop.f32.mrf.mxu0 }
 0x171   : > { %v735_v62 = vmul.f32 %v4014_v4, %v678_v16  ;;  %v1884_v23 = vsel %vm1872_vm3, %v1859_v34, %v1860_v15  ;;  %v1667_v60 = vsel %vm1655_vm1, %v1642_v51, %v1643_v39  ;;  %v848_v34 = vadd.s32 200, %v4016_v5 }
 0x172   : > { %v2004_v40 = vsel %vm1823_vm12, 0.0, %v1884_v23  ;;  %v1788_v36 = vsel %vm1607_vm13, 0.0, %v1667_v60  ;;  %v2275_v9 = vunpack.c.l.b16 %v2077_v46  ;;  %v4418_v46 = vld [vmem:[%s5206_s4] ss:$0 sm:$0xff] }
 0x173   : > { %v775_v33 = vadd.f32 %v4021_v6, %v735_v62  ;;  %v2112_v49 = vpack.c.bf16 %v2004_v40, %v2004_v40  ;;  %v2041_v38 = vpack.c.bf16 %v1788_v36, %v1788_v36  ;;  %v4409_v6 = vld [vmem:[%s5205_s3] ss:$0 sm:$0xff]  ;;  %v849_v40 = vadd.s32 208, %v4016_v5 }
 0x175   : > { %v811_v48 = vmax.f32 %v775_v33, 0.0  ;;  %v4399_v50 = vunpack.c.l.b16 %v2112_v49  ;;  %v1330_v33 = vand.u32 15, %v848_v34  ;;  %v4421_v49 = vunpack.c.l.b16 %v2041_v38 }
 0x177   : > { %v1644_v4 = vrot.slane %v811_v48, 7  ;;  %v2078_v16 = vpack.c.bf16 %v811_v48, %v811_v48  ;;  %v1861_v18 = vrot.slane %v811_v48, 1  ;;  %5277 = vst [vmem:[#allocation36_spill] sm:$0xff] %v4421_v49  ;;  %vm1825_vm15 = vcmp.eq.s32.totalorder %v1330_v33, 15 }
 0x178   : > { %v681_v44 = vpop.f32.mrf.mxu0 }
 0x179   : > { %v736_v45 = vmul.f32 %v4409_v6, %v681_v44  ;;  %v2276_v62 = vunpack.c.l.b16 %v2078_v16  ;;  %v1666_v23 = vsel %vm1655_vm1, %v1643_v39, %v1644_v4  ;;  %v1883_v39 = vsel %vm1872_vm3, %v1860_v15, %v1861_v18 }
 0x17a   : > { %v2042_v60 = vpack.c.bf16 %v1666_v23, %v1666_v23  ;;  %v1337_v23 = vand.u32 15, %v849_v40 }
 0x17b   : > { %v776_v48 = vadd.f32 %v4418_v46, %v736_v45  ;;  %v2299_v21 = vpack.c.b16 %v2276_v62, %v2275_v9  ;;  %v2113_v9 = vpack.c.bf16 %v1883_v39, %v1883_v39 }
 0x17c   : > { %v4423_v36 = vunpack.c.l.b16 %v2042_v60  ;;  %vm1609_vm2 = vcmp.eq.s32.totalorder %v1337_v23, 0 }
 0x17d   : > { %v812_v44 = vmax.f32 %v776_v48, 0.0  ;;  %2329 = vrot.lane.b32.xlu1 %v2299_v21, %s3831_s25  ;;  %v2401_v21 = vunpack.c.l.b16 %v2113_v9 }
 0x17e   : > { %5278 = vst [vmem:[#allocation37_spill] sm:$0xff] %v4423_v36 }
 0x17f   : > { %v1645_v51 = vrot.slane %v812_v44, 7  ;;  %v1862_v19 = vrot.slane %v812_v44, 1  ;;  %v2079_v22 = vpack.c.bf16 %v812_v44, %v812_v44  ;;  %v851_v44 = vadd.s32 224, %v4016_v5 }
 0x180   : > { %v683_v45 = vpop.f32.mrf.mxu0 }
 0x181   : > { %v737_v34 = vmul.f32 %v4409_v6, %v683_v45  ;;  %v1882_v38 = vsel %vm1872_vm3, %v1861_v18, %v1862_v19  ;;  %v1665_v62 = vsel %vm1655_vm1, %v1644_v4, %v1645_v51  ;;  %v850_v45 = vadd.s32 216, %v4016_v5 }
 0x182   : > { %v2006_v60 = vsel %vm1825_vm15, 0.0, %v1882_v38  ;;  %v1790_v33 = vsel %vm1609_vm2, 0.0, %v1665_v62  ;;  %v2277_v4 = vunpack.c.l.b16 %v2079_v22  ;;  %vm3097_vm2 = vcmask 1041408  }
 0x183   : > { %v777_v15 = vadd.f32 %v4418_v46, %v737_v34  ;;  %v2114_v48 = vpack.c.bf16 %v2006_v60, %v2006_v60  ;;  %v2043_v18 = vpack.c.bf16 %v1790_v33, %v1790_v33  ;;  %v1344_v60 = vand.u32 15, %v850_v45 }
 0x185   : > { %v813_v40 = vmax.f32 %v777_v15, 0.0  ;;  %v2402_v16 = vunpack.c.l.b16 %v2114_v48  ;;  %v4443_v15 = vunpack.c.l.b16 %v2043_v18  ;;  %vm1827_vm4 = vcmp.eq.s32.totalorder %v1344_v60, 15 }
 0x187   : > { %v1646_v49 = vrot.slane %v813_v40, 7  ;;  %v2425_v39 = vpack.c.b16 %v2402_v16, %v2401_v21  ;;  %v2080_v36 = vpack.c.bf16 %v813_v40, %v813_v40  ;;  %v1863_v34 = vrot.slane %v813_v40, 1 }
 0x188   : > { %v686_v54 = vpop.f32.mrf.mxu0 }
 0x189   : > { %v738_v37 = vmul.f32 %v4409_v6, %v686_v54  ;;  %2455 = vrot.lane.b32.xlu1 %v2425_v39, %s3832_s13  ;;  %v2278_v23 = vunpack.c.l.b16 %v2080_v36  ;;  %v1664_v9 = vsel %vm1655_vm1, %v1645_v51, %v1646_v49  ;;  %v1881_v22 = vsel %vm1872_vm3, %v1862_v19, %v1863_v34 }
 0x18a   : > { %v2044_v38 = vpack.c.bf16 %v1664_v9, %v1664_v9  ;;  %v1351_v36 = vand.u32 15, %v851_v44  ;;  %v2115_v45 = vpack.c.bf16 %v1881_v22, %v1881_v22  ;;  %v2074_v19 = vpack.c.bf16 %v4337_v24, %v4337_v24 }
 0x18b   : > { %v778_v16 = vadd.f32 %v4418_v46, %v738_v37  ;;  %v2300_v62 = vpack.c.b16 %v2278_v23, %v2277_v4 }
 0x18c   : > { %v4445_v48 = vunpack.c.l.b16 %v2044_v38  ;;  %vm1611_vm5 = vcmp.eq.s32.totalorder %v1351_v36, 0  ;;  %v2073_v38 = vpack.c.bf16 %v4324_v52, %v4324_v52  ;;  %v2272_v60 = vunpack.c.l.b16 %v2074_v19 }
 0x18d   : > { %v814_v54 = vmax.f32 %v778_v16, 0.0  ;;  %2331 = vrot.lane.b32.xlu0 %v2300_v62, %s3831_s25  ;;  %v2403_v16 = vunpack.c.l.b16 %v2115_v45  ;;  %v852_v36 = vadd.s32 232, %v4016_v5  ;;  %v853_v45 = vadd.s32 240, %v4016_v5 }
 0x18e   : > { %v2271_v52 = vunpack.c.l.b16 %v2073_v38 }
 0x18f   : > { %v1647_v21 = vrot.slane %v814_v54, 7  ;;  %v1864_v40 = vrot.slane %v814_v54, 1  ;;  %v1365_v38 = vand.u32 15, %v853_v45 }
 0x190   : > { %v688_v37 = vpop.f32.mrf.mxu0 }
 0x191   : > { %v739_v33 = vmul.f32 %v4409_v6, %v688_v37  ;;  %v1880_v39 = vsel %vm1872_vm3, %v1863_v34, %v1864_v40  ;;  %v1663_v18 = vsel %vm1655_vm1, %v1646_v49, %v1647_v21  ;;  %v5279_v34 = vpack.c.b16 %v4341_v1, %v4339_v11 }
 0x192   : > { %v2008_v4 = vsel %vm1827_vm4, 0.0, %v1880_v39  ;;  %v1792_v49 = vsel %vm1611_vm5, 0.0, %v1663_v18  ;;  %vm1613_vm7 = vcmp.eq.s32.totalorder %v1365_v38, 0  ;;  %v5280_v38 = vpack.c.b16 %v4369_v63, %v4367_v41 }
 0x193   : > { %v779_v23 = vadd.f32 %v4418_v46, %v739_v33  ;;  %v2116_v9 = vpack.c.bf16 %v2008_v4, %v2008_v4  ;;  %v2045_v39 = vpack.c.bf16 %v1792_v49, %v1792_v49 }
 0x195   : > { %v815_v44 = vmax.f32 %v779_v23, 0.0  ;;  %2449 = vrot.lane.b32.xlu0 %v5279_v34, %s3832_s13  ;;  %v2404_v62 = vunpack.c.l.b16 %v2116_v9  ;;  %v2081_v23 = vpack.c.bf16 %v814_v54, %v814_v54  ;;  %v2297_v9 = vpack.c.b16 %v2272_v60, %v2271_v52 }
 0x197   : > { %v1648_v22 = vrot.slane %v815_v44, 7  ;;  %v2426_v37 = vpack.c.b16 %v2404_v62, %v2403_v16  ;;  %v2082_v24 = vpack.c.bf16 %v815_v44, %v815_v44  ;;  %v1865_v1 = vrot.slane %v815_v44, 1 }
 0x198   : > { %v691_v33 = vpop.f32.mrf.mxu0  ;;  %v1358_v16 = vand.u32 15, %v852_v36  ;;  %v4473_v62 = vunpack.c.l.b16 %v2045_v39  ;;  %v2279_v54 = vunpack.c.l.b16 %v2081_v23  ;;  %v854_v44 = vadd.s32 248, %v4016_v5 }
 0x199   : > { %v740_v4 = vmul.f32 %v4409_v6, %v691_v33  ;;  %2457 = vrot.lane.b32.xlu1 %v2426_v37, %s3832_s13  ;;  %v1662_v11 = vsel %vm1655_vm1, %v1647_v21, %v1648_v22  ;;  %v2280_v34 = vunpack.c.l.b16 %v2082_v24  ;;  %v1879_v21 = vsel %vm1872_vm3, %v1864_v40, %v1865_v1 }
 0x19a   : > { %v2046_v18 = vpack.c.bf16 %v1662_v11, %v1662_v11  ;;  %vm1829_vm6 = vcmp.eq.s32.totalorder %v1358_v16, 15  ;;  %v2117_v52 = vpack.c.bf16 %v1879_v21, %v1879_v21 }
 0x19b   : > { %v780_v19 = vadd.f32 %v4418_v46, %v740_v4  ;;  %v2301_v60 = vpack.c.b16 %v2280_v34, %v2279_v54 }
 0x19c   : > { %v4475_v49 = vunpack.c.l.b16 %v2046_v18 }
 0x19d   : > { %v816_v33 = vmax.f32 %v780_v19, 0.0  ;;  %2325 = vrot.lane.b32.xlu0 %v2297_v9, %s3831_s25  ;;  %v2405_v9 = vunpack.c.l.b16 %v2117_v52 }
 0x19f   : > { %v1649_v37 = vrot.slane %v816_v33, 7  ;;  %v1866_v4 = vrot.slane %v816_v33, 1  ;;  %v2320_v11 = vpop.permute.xlu0 %2319 }
 0x1a0   : > { %v693_v24 = vpop.f32.mrf.mxu0 }
 0x1a1   : > { %v741_v36 = vmul.f32 %v4409_v6, %v693_v24  ;;  %2333 = vrot.lane.b32.xlu1 %v2301_v60, %s3831_s25  ;;  %v1878_v39 = vsel %vm1872_vm3, %v1865_v1, %v1866_v4  ;;  %v1661_v40 = vsel %vm1655_vm1, %v1648_v22, %v1649_v37 }
 0x1a2   : > { %v2010_v23 = vsel %vm1829_vm6, 0.0, %v1878_v39  ;;  %v1794_v16 = vsel %vm1613_vm7, 0.0, %v1661_v40  ;;  %v855_v40 = vadd.s32 256, %v4016_v5 }
 0x1a3   : > { %v781_v45 = vadd.f32 %v4418_v46, %v741_v36  ;;  %v2118_v18 = vpack.c.bf16 %v2010_v23, %v2010_v23  ;;  %v2047_v21 = vpack.c.bf16 %v1794_v16, %v1794_v16  ;;  %v2083_v36 = vpack.c.bf16 %v816_v33, %v816_v33 }
 0x1a4   : > { %v5281_v23 = vpack.c.b16 %v4275_v61, %v4273_v31  ;;  %v856_v61 = vadd.s32 264, %v4016_v5 }
 0x1a5   : > { %v817_v19 = vmax.f32 %v781_v45, 0.0  ;;  %v2406_v34 = vunpack.c.l.b16 %v2118_v18  ;;  %v2281_v16 = vunpack.c.l.b16 %v2083_v36 }
 0x1a6   : > { %v2491_v45 = vsel %vm2467_vm8, %v5281_v23, %v2320_v11  ;;  %v1379_v11 = vand.u32 15, %v855_v40 }
 0x1a7   : > { %v1650_v54 = vrot.slane %v817_v19, 7  ;;  %v2427_v24 = vpack.c.b16 %v2406_v34, %v2405_v9  ;;  %v2084_v60 = vpack.c.bf16 %v817_v19, %v817_v19  ;;  %v1867_v51 = vrot.slane %v817_v19, 1 }
 0x1a8   : > { %v696_v1 = vpop.f32.mrf.mxu0  ;;  %v1372_v19 = vand.u32 15, %v854_v44  ;;  %v4507_v9 = vunpack.c.l.b16 %v2047_v21  ;;  %vm1615_vm12 = vcmp.eq.s32.totalorder %v1379_v11, 0 }
 0x1a9   : > { %v742_v22 = vmul.f32 %v4409_v6, %v696_v1  ;;  %2451 = vrot.lane.b32.xlu1 %v5280_v38, %s3832_s13  ;;  %2459 = vrot.lane.b32.xlu2 %v2427_v24, %s3832_s13  ;;  %v1660_v39 = vsel %vm1655_vm1, %v1649_v37, %v1650_v54  ;;  %v2282_v63 = vunpack.c.l.b16 %v2084_v60  ;;  %v1877_v31 = vsel %vm1872_vm3, %v1866_v4, %v1867_v51 }
 0x1aa   : > { %v2048_v52 = vpack.c.bf16 %v1660_v39, %v1660_v39  ;;  %vm1831_vm11 = vcmp.eq.s32.totalorder %v1372_v19, 15  ;;  %v824_v38 = vadd.s32 8, %v4016_v5  ;;  %v2322_v39 = vpop.permute.xlu2 %2321  ;;  %v5282_v4 = vpack.c.b16 %v4377_v7, %v4374_v58 }
 0x1ab   : > { %v782_v18 = vadd.f32 %v4418_v46, %v742_v22  ;;  %v2446_v41 = vpop.permute.xlu0 %2445  ;;  %v2302_v1 = vpack.c.b16 %v2282_v63, %v2281_v16  ;;  %v2119_v22 = vpack.c.bf16 %v1877_v31, %v1877_v31 }
 0x1ac   : > { %v4505_v33 = vsel %vm2522_vm9, %v2491_v45, %v2446_v41  ;;  %v4509_v37 = vunpack.c.l.b16 %v2048_v52  ;;  %v1386_v45 = vand.u32 15, %v856_v61  ;;  %v1162_v19 = vand.u32 15, %v824_v38 }
 0x1ad   : > { %v818_v34 = vmax.f32 %v782_v18, 0.0  ;;  %3519 = vmatmul.msk.bf16.vlgmr.msra.gmra.mxu2 %vm2569_vm10, %v4505_v33  ;;  %v2407_v7 = vunpack.c.l.b16 %v2119_v22  ;;  %v5288_v22 = vrot.slane %v4029_v14, 1 }
 0x1ae   : > { %v2212_v44 = vpack.c.b16 %v4509_v37, %v4507_v9  ;;  %vm4535_vm13 = vcmp.eq.s32.totalorder %v1386_v45, 15  ;;  %vm4543_vm15 = vcmp.eq.s32.totalorder %v1162_v19, 15 }
 0x1af   : > { %v1651_v24 = vrot.slane %v818_v34, 7  ;;  %v1868_v60 = vrot.slane %v818_v34, 1 }
 0x1b0   : > { %v698_v21 = vpop.f32.mrf.mxu0 }
 0x1b1   : > { %v743_v36 = vmul.f32 %v4409_v6, %v698_v21  ;;  %2327 = vrot.lane.b32.xlu1 %v5282_v4, %s3831_s25  ;;  %2335 = vrot.lane.b32.xlu2 %v2302_v1, %s3831_s25  ;;  %v1876_v52 = vsel %vm1872_vm3, %v1867_v51, %v1868_v60  ;;  %v1659_v40 = vsel %vm1655_vm1, %v1650_v54, %v1651_v24  ;;  %v5283_v6 = vmov 0.0  }
 0x1b2   : > { %v2012_v23 = vsel %vm1831_vm11, 0.0, %v1876_v52  ;;  %v4531_v63 = vrot.slane %v5283_v6, 1  ;;  %v1796_v31 = vsel %vm1615_vm12, 0.0, %v1659_v40  ;;  %v2085_v1 = vpack.c.bf16 %v818_v34, %v818_v34  ;;  %v2448_v52 = vpop.permute.xlu2 %2447 }
 0x1b3   : > { %v783_v18 = vadd.f32 %v4418_v46, %v743_v36  ;;  %v2120_v41 = vpack.c.bf16 %v2012_v23, %v2012_v23  ;;  %v2049_v36 = vpack.c.bf16 %v1796_v31, %v1796_v31  ;;  %v5289_v40 = vpack.c.b16 %v4399_v50, %v4401_v13 }
 0x1b4   : > { %v1906_v38 = vsel %vm1872_vm3, %v4531_v63, %v5288_v22  ;;  %v3833_v34 = vmov 0.0|0.0   ;;  %v5290_v6 = vpack.c.b16 %v4298_v8, %v4296_v35  ;;  %v2283_v35 = vunpack.c.l.b16 %v2085_v1 }
 0x1b5   : > { %v4533_v58 = vmax.f32 %v783_v18, 0.0  ;;  %v2408_v16 = vunpack.c.l.b16 %v2120_v41  ;;  %v2251_v23 = vunpack.c.l.b16 %v3833_v34  ;;  %v2089_v22 = vpack.c.bf16 %v4531_v63, %v4531_v63 }
 0x1b6   : > { %v2494_v19 = vsel %vm2467_vm8, %v5290_v6, %v2322_v39  ;;  %v5292_v34 = vpack.c.b16 %v4091_v32, %v4089_v30  ;;  %v5295_v32 = vpack.c.b16 %v4076_v10, %v4079_v17  ;;  %v5298_v17 = vpack.c.b16 %v4161_v55, %v4159_v53 }
 0x1b7   : > { %v1652_v54 = vrot.slane %v4533_v58, 7  ;;  %v1869_v61 = vrot.slane %v4533_v58, 1  ;;  %v2428_v11 = vpack.c.b16 %v2408_v16, %v2407_v7  ;;  %v2086_v46 = vpack.c.bf16 %v4533_v58, %v4533_v58 }
 0x1b8   : > { %v701_v4 = vpop.f32.mrf.mxu0  ;;  %v4575_v31 = vsel %vm2522_vm9, %v2494_v19, %v2448_v52  ;;  %v5299_v53 = vpack.c.b16 %v4196_v29, %v4194_v28  ;;  %v5301_v19 = vld [vmem:[#allocation29_spill] sm:$0xff]  ;;  %v5305_v29 = vld [vmem:[#allocation36_spill] sm:$0xff] }
 0x1b9   : > { %2453 = vrot.lane.b32.xlu2 %v5289_v40, %s3832_s13  ;;  %2461 = vrot.lane.b32.xlu0 %v2428_v11, %s3832_s13  ;;  %v1874_v14 = vsel %vm1872_vm3, %v1869_v61, %v4531_v63  ;;  %v1875_v45 = vsel %vm1872_vm3, %v1868_v60, %v1869_v61  ;;  %v1658_v18 = vsel %vm1655_vm1, %v1651_v24, %v1652_v54  ;;  %v2284_v7 = vunpack.c.l.b16 %v2086_v46  ;;  %v5304_v28 = vld [vmem:[#allocation37_spill] sm:$0xff] }
 0x1ba   : > { %v2014_v50 = vsel %vm4535_vm13, 0.0, %v1874_v14  ;;  %v2121_v13 = vpack.c.bf16 %v1875_v45, %v1875_v45  ;;  %v2050_v41 = vpack.c.bf16 %v1658_v18, %v1658_v18  ;;  %v1982_v60 = vsel %vm4543_vm15, 0.0, %v1906_v38  ;;  %v3596_v14 = vld [vmem:[%s5207_s5] sm:$0x30] }
 0x1bb   : > { %v2122_v16 = vpack.c.bf16 %v2014_v50, %v2014_v50  ;;  %v4577_v24 = vunpack.c.l.b16 %v2049_v36  ;;  %v2287_v11 = vpack.c.b16 %v2251_v23, %v2251_v23  ;;  %v2303_v46 = vpack.c.b16 %v2284_v7, %v2283_v35  ;;  %v3531_v23 = vld [vmem:[%s5207_s5] sm:$0xf]  ;;  %v5302_v7 = vld [vmem:[#allocation28_spill] sm:$0xff] }
 0x1bc   : > { %v2409_v61 = vunpack.c.l.b16 %v2121_v13  ;;  %v4579_v51 = vunpack.c.l.b16 %v2050_v41  ;;  %v2090_v38 = vpack.c.bf16 %v1982_v60, %v1982_v60  ;;  %v2377_v36 = vunpack.c.l.b16 %v2089_v22  ;;  %v5308_v22 = vld [vmem:[#allocation30_spill] sm:$0xff] }
 0x1bd   : > { %3520 = vmatmul.msk.bf16.gmra.mxu2 %vm2569_vm10, %v4575_v31  ;;  %v2410_v8 = vunpack.c.l.b16 %v2122_v16  ;;  %v5291_v40 = vpack.c.b16 %v4111_v0, %v4113_v3  ;;  %v5293_v0 = vpack.c.b16 %v4126_v27, %v4124_v26  ;;  %v5294_v3 = vpack.c.b16 %v4056_v43, %v4054_v42 }
 0x1be   : > { %v2213_v39 = vpack.c.b16 %v4579_v51, %v4577_v24  ;;  %v2378_v52 = vunpack.c.l.b16 %v2090_v38  ;;  %v3532_v30 = vor.u32 %v3596_v14, %v3531_v23  ;;  %v2066_v18 = vpack.c.bf16 %v4220_v25, %v4220_v25 }
 0x1bf   : > { %v2429_v21 = vpack.c.b16 %v2410_v8, %v2409_v61  ;;  %v858_v26 = vadd.s32 280, %v4016_v5  ;;  %v5296_v27 = vpack.c.b16 %v4181_v57, %v4183_v59  ;;  %v5297_v42 = vpack.c.b16 %v4146_v12, %v4149_v20  ;;  %v3553_v59 = vld [vmem:[%s5207_s5 + $0x10] sm:$0xf]  ;;  %v3598_v12 = vld [vmem:[%s5207_s5 + $0x10] sm:$0x30] }
 0x1c0   : > { %v703_v4 = vpop.f32.mrf.mxu0  ;;  %v2413_v1 = vpack.c.b16 %v2378_v52, %v2377_v36  ;;  %v2703_v45 = vsel %vm2602_vm14, %v3532_v30, 0  ;;  %v2065_v43 = vpack.c.bf16 %v4208_v2, %v4208_v2  ;;  %v2264_v25 = vunpack.c.l.b16 %v2066_v18 }
 0x1c1   : > { %2305 = vrot.lane.b32.xlu2 %v2287_v11, %s3831_s25  ;;  %2337 = vrot.lane.b32.xlu0 %v2303_v46, %s3831_s25  ;;  %v1400_v10 = vand.u32 15, %v858_v26  ;;  %v3554_v2 = vor.u32 %v3598_v12, %v3553_v59  ;;  %v5303_v16 = vpack.c.b16 %v5301_v19, %v5302_v7  ;;  %v5306_v61 = vpack.c.b16 %v5304_v28, %v5305_v29  ;;  %v2324_v46 = vpop.permute.xlu2 %2323 }
 0x1c2   : > { %2463 = vrot.lane.b32.xlu1 %v2429_v21, %s3832_s13  ;;  %2712 = vmatpush.bf16.msrb.mxu2 %v2703_v45  ;;  %v2263_v57 = vunpack.c.l.b16 %v2065_v43  ;;  %v5307_v21 = vld [vmem:[#allocation31_spill] sm:$0xff]  ;;  %v5310_v52 = vpack.c.b16 %v4445_v48, %v4443_v15  ;;  %v5313_v45 = vld [vmem:[#allocation32_spill] sm:$0xff] }
 0x1c3   : > { %vm1835_vm3 = vcmp.eq.s32.totalorder %v1400_v10, 15  ;;  %v2805_v41 = vsel %vm2602_vm14, %v3554_v2, 0  ;;  %v5309_v38 = vpack.c.b16 %v5307_v21, %v5308_v22  ;;  %v5315_v10 = vld [vmem:[#allocation35_spill] sm:$0xff]  ;;  %v5323_v21 = vld [vmem:[#allocation16_spill] sm:$0xff] }
 0x1c4   : > { %v2016_v50 = vsel %vm1835_vm3, 0.0, %v4531_v63  ;;  %v2293_v13 = vpack.c.b16 %v2264_v25, %v2263_v57  ;;  %v5300_v63 = vpack.c.b16 %v4224_v56, %v4222_v47  ;;  %2814 = vmatpush.bf16.msrb.mxu3 %v2805_v41  ;;  %v5318_v57 = vld [vmem:[#allocation15_spill] sm:$0xff] }
 0x1c5   : > { %v2124_v20 = vpack.c.bf16 %v2016_v50, %v2016_v50 }
 0x1c7   : > { %v2412_v55 = vunpack.c.l.b16 %v2124_v20 }
 0x1c9   : > { %2435 = vrot.lane.b32.xlu2 %v5291_v40, %s3832_s13  ;;  %2431 = vrot.lane.b32.xlu0 %v2413_v1, %s3832_s13  ;;  %v2430_v6 = vpack.c.b16 %v2412_v55, %v2377_v36 }
 0x1ca   : > { %2309 = vrot.lane.b32.xlu1 %v5292_v34, %s3831_s25 }
 0x1d1   : > { %2311 = vrot.lane.b32.xlu2 %v5293_v0, %s3831_s25  ;;  %2307 = vrot.lane.b32.xlu0 %v5294_v3, %s3831_s25  ;;  %v5311_v3 = vpack.c.b16 %v4475_v49, %v4473_v62  ;;  %v1155_v49 = vand.u32 15, %v4016_v5 }
 0x1d2   : > { %2433 = vrot.lane.b32.xlu1 %v5295_v32, %s3832_s13  ;;  %v5312_v32 = vld [vmem:[#allocation33_spill] sm:$0xff] }
 0x1d3   : > { %v5314_v15 = vpack.c.b16 %v5312_v32, %v5313_v45  ;;  %vm1583_vm14 = vcmp.eq.s32.totalorder %v1155_v49, 0  ;;  %v5328_v32 = vld [vmem:[#allocation23_spill] sm:$0xff]  ;;  %v5329_v45 = vld [vmem:[#allocation22_spill] sm:$0xff] }
 0x1d4   : > { %v1764_v59 = vsel %vm1583_vm14, 0.0, %v5318_v57 }
 0x1d5   : > { %v2017_v41 = vpack.c.bf16 %v1764_v59, %v1764_v59 }
 0x1d7   : > { %v2161_v9 = vunpack.c.l.b16 %v2017_v41 }
 0x1d9   : > { %2439 = vrot.lane.b32.xlu2 %v5296_v27, %s3832_s13  ;;  %2437 = vrot.lane.b32.xlu0 %v5297_v42, %s3832_s13 }
 0x1da   : > { %2313 = vrot.lane.b32.xlu1 %v5298_v17, %s3831_s25  ;;  %v5316_v17 = vld [vmem:[#allocation34_spill] sm:$0xff] }
 0x1db   : > { %v5317_v25 = vpack.c.b16 %v5315_v10, %v5316_v17  ;;  %v5332_v10 = vld [vmem:[#allocation24_spill] sm:$0xff] }
 0x1e1   : > { %2317 = vrot.lane.b32.xlu2 %v2293_v13, %s3831_s25  ;;  %2315 = vrot.lane.b32.xlu0 %v5299_v53, %s3831_s25  ;;  %v2018_v53 = vpack.c.bf16 %v5318_v57, %v5318_v57 }
 0x1e2   : > { %2441 = vrot.lane.b32.xlu1 %v5300_v63, %s3832_s13 }
 0x1e3   : > { %v4725_v37 = vunpack.c.l.b16 %v2018_v53 }
 0x1e9   : > { %2443 = vrot.lane.b32.xlu0 %v5303_v16, %s3832_s13  ;;  %2465 = vrot.lane.b32.xlu2 %v2430_v6, %s3832_s13  ;;  %v2197_v6 = vpack.c.b16 %v4725_v37, %v2161_v9 }
 0x1ea   : > { %2339 = vrot.lane.b32.xlu1 %v2287_v11, %s3831_s25  ;;  %v2497_v11 = vsel %vm2467_vm8, %v5309_v38, %v2324_v46 }
 0x1ef   : > { %v2330_v60 = vpop.permute.xlu1 %2329 }
 0x1f0   : > { %v2506_v35 = vsel %vm2467_vm8, %v5306_v61, %v2330_v60 }
 0x1fb   : > { %v2456_v8 = vpop.permute.xlu1 %2455 }
 0x1fc   : > { %v4663_v47 = vsel %vm2522_vm9, %v2506_v35, %v2456_v8  ;;  %v5319_v35 = vld [vmem:[#allocation19_spill] sm:$0xff]  ;;  %v5320_v8 = vld [vmem:[#allocation18_spill] sm:$0xff] }
 0x1fd   : > { %3524 = vmatmul.msk.bf16.vlgmr.msra.gmra.mxu3 %vm2569_vm10, %v4663_v47 }
 0x1ff   : > { %v2332_v56 = vpop.permute.xlu0 %2331 }
 0x200   : > { %v2509_v1 = vsel %vm2467_vm8, %v5310_v52, %v2332_v56  ;;  %v5321_v56 = vpack.c.b16 %v5319_v35, %v5320_v8 }
 0x203   : > { %v2460_v14 = vpop.permute.xlu2 %2459 }
 0x207   : > { %v2450_v4 = vpop.permute.xlu0 %2449 }
 0x208   : > { %v4672_v36 = vsel %vm2522_vm9, %v2497_v11, %v2450_v4 }
 0x209   : > { %3521 = vmatmul.msk.bf16.gmra.mxu2 %vm2569_vm10, %v4672_v36 }
 0x20b   : > { %v2458_v40 = vpop.permute.xlu1 %2457  ;;  %v2336_v62 = vpop.permute.xlu2 %2335 }
 0x20c   : > { %v4681_v34 = vsel %vm2522_vm9, %v2509_v1, %v2458_v40  ;;  %v2515_v12 = vsel %vm2467_vm8, %v2212_v44, %v2336_v62  ;;  %v5325_v1 = vld [vmem:[#allocation21_spill] sm:$0xff]  ;;  %v5326_v40 = vld [vmem:[#allocation20_spill] sm:$0xff] }
 0x20d   : > { %3525 = vmatmul.msk.bf16.gmra.mxu3 %vm2569_vm10, %v4681_v34 }
 0x20f   : > { %v2326_v0 = vpop.permute.xlu0 %2325 }
 0x210   : > { %v2500_v48 = vsel %vm2467_vm8, %v5314_v15, %v2326_v0  ;;  %v5330_v15 = vpack.c.b16 %v5328_v32, %v5329_v45 }
 0x213   : > { %v2334_v23 = vpop.permute.xlu1 %2333  ;;  %v2454_v43 = vpop.permute.xlu2 %2453 }
 0x214   : > { %v2512_v30 = vsel %vm2467_vm8, %v5311_v3, %v2334_v23  ;;  %v5327_v23 = vpack.c.b16 %v5325_v1, %v5326_v40 }
 0x215   : > { %v4697_v27 = vsel %vm2522_vm9, %v2512_v30, %v2460_v14 }
 0x21b   : > { %v2452_v18 = vpop.permute.xlu1 %2451  ;;  %v2306_v44 = vpop.permute.xlu2 %2305 }
 0x21c   : > { %v4694_v26 = vsel %vm2522_vm9, %v2500_v48, %v2452_v18  ;;  %v2470_v19 = vsel %vm2467_vm8, %v2197_v6, %v2306_v44 }
 0x21d   : > { %3522 = vmatmul.msk.bf16.gmra.mxu2 %vm2569_vm10, %v4694_v26  ;;  %3526 = vmatmul.msk.bf16.gmra.mxu3 %vm2569_vm10, %v4697_v27 }
 0x223   : > { %v2328_v42 = vpop.permute.xlu1 %2327  ;;  %v2436_v61 = vpop.permute.xlu2 %2435 }
 0x224   : > { %v2503_v50 = vsel %vm2467_vm8, %v5317_v25, %v2328_v42 }
 0x225   : > { %v4714_v2 = vsel %vm2522_vm9, %v2503_v50, %v2454_v43  ;;  %v5331_v43 = vld [vmem:[#allocation25_spill] sm:$0xff] }
 0x226   : > { %v5333_v17 = vpack.c.b16 %v5331_v43, %v5332_v10 }
 0x22b   : > { %v2462_v20 = vpop.permute.xlu0 %2461  ;;  %v2312_v52 = vpop.permute.xlu2 %2311 }
 0x22c   : > { %v4717_v13 = vsel %vm2522_vm9, %v2515_v12, %v2462_v20  ;;  %v2479_v14 = vsel %vm2467_vm8, %v5327_v23, %v2312_v52  ;;  %v3048_v12 = vld [vmem:[%s5210_s8] sm:$0x3] }
 0x22d   : > { %3523 = vmatmul.msk.bf16.gmra.mxu2 %vm2569_vm10, %v4714_v2  ;;  %3527 = vmatmul.msk.bf16.gmra.mxu3 %vm2569_vm10, %v4717_v13  ;;  %v3099_v20 = vsel %vm3097_vm2, %v3048_v12, 0 }
 0x22e   : > { %3108 = vmatpush.bf16.msrb.mxu1 %v3099_v20 }
 0x230   : > { %v4768_v49 = vpop.f32.mrf.mxu2 }
 0x233   : > { %v2338_v55 = vpop.permute.xlu0 %2337  ;;  %v2440_v18 = vpop.permute.xlu2 %2439 }
 0x234   : > { %v2464_v63 = vpop.permute.xlu1 %2463  ;;  %v2518_v7 = vsel %vm2467_vm8, %v2213_v39, %v2338_v55  ;;  %v5322_v39 = vld [vmem:[#allocation17_spill] sm:$0xff]  ;;  %v5334_v55 = vld [vmem:[#allocation27_spill] sm:$0xff] }
 0x235   : > { %v4735_v29 = vsel %vm2522_vm9, %v2518_v7, %v2464_v63  ;;  %v5324_v22 = vpack.c.b16 %v5322_v39, %v5323_v21  ;;  %v5335_v63 = vld [vmem:[#allocation26_spill] sm:$0xff] }
 0x236   : > { %v5336_v6 = vpack.c.b16 %v5334_v55, %v5335_v63 }
 0x238   : > { %v4781_v41 = vpop.f32.mrf.mxu2 }
 0x23b   : > { %v2432_v16 = vpop.permute.xlu0 %2431  ;;  %v2318_v53 = vpop.permute.xlu2 %2317 }
 0x23c   : > { %v2524_v60 = vsel %vm2522_vm9, %v2470_v19, %v2432_v16  ;;  %v2310_v28 = vpop.permute.xlu1 %2309  ;;  %v2488_v19 = vsel %vm2467_vm8, %v5336_v6, %v2318_v53 }
 0x23d   : > { %v2476_v46 = vsel %vm2467_vm8, %v5321_v56, %v2310_v28  ;;  %3528 = vmatmul.msk.bf16.gmra.mxu3 %vm2569_vm10, %v4735_v29  ;;  %3533 = vmatmul.msk.bf16.vlgmr.msrb.gmra.mxu2 %vm2569_vm10, %v2524_v60 }
 0x23e   : > { %v2528_v24 = vsel %vm2522_vm9, %v2476_v46, %v2436_v61 }
 0x23f   : > { %3514 = vmatmul.msk.bf16.vlgmr.msra.gmra.mxu1 %vm2569_vm10, %v2528_v24 }
 0x240   : > { %v4783_v44 = vpop.f32.mrf.mxu2 }
 0x243   : > { %v2308_v51 = vpop.permute.xlu0 %2307 }
 0x244   : > { %v2473_v38 = vsel %vm2467_vm8, %v5324_v22, %v2308_v51  ;;  %v2434_v11 = vpop.permute.xlu1 %2433 }
 0x245   : > { %v2526_v4 = vsel %vm2522_vm9, %v2473_v38, %v2434_v11 }
 0x246   : > { %3513 = vmatmul.msk.bf16.vlgmr.msrb.gmra.mxu0 %vm2569_vm10, %v2526_v4 }
 0x248   : > { %v4795_v60 = vpop.f32.mrf.mxu2 }
 0x24b   : > { %v2438_v0 = vpop.permute.xlu0 %2437 }
 0x24c   : > { %v2530_v3 = vsel %vm2522_vm9, %v2479_v14, %v2438_v0  ;;  %v2314_v30 = vpop.permute.xlu1 %2313 }
 0x24d   : > { %3534 = vmatmul.msk.bf16.gmra.mxu2 %vm2569_vm10, %v2526_v4  ;;  %3555 = vmatmul.msk.bf16.vlgmr.msrb.gmra.mxu3 %vm2569_vm10, %v2528_v24  ;;  %v2482_v48 = vsel %vm2467_vm8, %v5330_v15, %v2314_v30  ;;  %v4847_v30 = vld [vmem:[%s5208_s6] ss:$0 sm:$0xff] }
 0x24e   : > { %v2532_v62 = vsel %vm2522_vm9, %v2482_v48, %v2440_v18 }
 0x24f   : > { %3515 = vmatmul.msk.bf16.gmra.mxu1 %vm2569_vm10, %v2530_v3 }
 0x253   : > { %v2316_v42 = vpop.permute.xlu0 %2315 }
 0x254   : > { %v2485_v25 = vsel %vm2467_vm8, %v5333_v17, %v2316_v42  ;;  %v2442_v50 = vpop.permute.xlu1 %2441 }
 0x255   : > { %v2534_v59 = vsel %vm2522_vm9, %v2485_v25, %v2442_v50 }
 0x25b   : > { %v2444_v9 = vpop.permute.xlu0 %2443 }
 0x25c   : > { %v2536_v7 = vsel %vm2522_vm9, %v2488_v19, %v2444_v9 }
 0x25d   : > { %3535 = vmatmul.msk.bf16.gmra.mxu2 %vm2569_vm10, %v2528_v24  ;;  %3556 = vmatmul.msk.bf16.gmra.mxu3 %vm2569_vm10, %v2530_v3 }
 0x25f   : > { %3516 = vmatmul.msk.bf16.gmra.mxu1 %vm2569_vm10, %v2532_v62 }
 0x26d   : > { %3536 = vmatmul.msk.bf16.gmra.mxu2 %vm2569_vm10, %v2530_v3  ;;  %3557 = vmatmul.msk.bf16.gmra.mxu3 %vm2569_vm10, %v2532_v62 }
 0x26f   : > { %3517 = vmatmul.msk.bf16.gmra.mxu1 %vm2569_vm10, %v2534_v59 }
 0x27d   : > { %3537 = vmatmul.msk.bf16.gmra.mxu2 %vm2569_vm10, %v2532_v62  ;;  %3558 = vmatmul.msk.bf16.gmra.mxu3 %vm2569_vm10, %v2534_v59 }
 0x27f   : > { %3518 = vmatmul.msk.bf16.gmra.mxu1 %vm2569_vm10, %v2536_v7 }
 0x280   : > { %v4793_v16 = vpop.f32.mrf.mxu3 }
 0x288   : > { %v4797_v28 = vpop.f32.mrf.mxu3 }
 0x28c   : > { %v4801_v61 = vpop.f32.mrf.mxu2 }
 0x28d   : > { %3538 = vmatmul.msk.bf16.gmra.mxu2 %vm2569_vm10, %v2534_v59  ;;  %3559 = vmatmul.msk.bf16.gmra.mxu3 %vm2569_vm10, %v2536_v7 }
 0x290   : > { %v4803_v35 = vpop.f32.mrf.mxu3 }
 0x294   : > { %v4805_v8 = vpop.f32.mrf.mxu2 }
 0x298   : > { %v4807_v56 = vpop.f32.mrf.mxu3 }
 0x29d   : > { %3539 = vmatmul.msk.bf16.gmra.mxu2 %vm2569_vm10, %v2536_v7  ;;  %3560 = vmatmul.msk.bf16.gmra.mxu3 %vm2569_vm10, %v4505_v33 }
 0x2a0   : > { %v4812_v46 = vpop.f32.mrf.mxu2  ;;  %v4814_v24 = vpop.f32.mrf.mxu3 }
 0x2a8   : > { %v4816_v51 = vpop.f32.mrf.mxu2  ;;  %v4818_v39 = vpop.f32.mrf.mxu3 }
 0x2ad   : > { %3540 = vmatmul.msk.bf16.gmra.mxu2 %vm2569_vm10, %v4505_v33  ;;  %3561 = vmatmul.msk.bf16.gmra.mxu3 %vm2569_vm10, %v4575_v31 }
 0x2b0   : > { %v4824_v21 = vpop.f32.mrf.mxu2  ;;  %v4826_v22 = vpop.f32.mrf.mxu3 }
 0x2b8   : > { %v4828_v38 = vpop.f32.mrf.mxu2  ;;  %v4830_v11 = vpop.f32.mrf.mxu3 }
 0x2bc   : > { %v2620_v23 = vpop.f32.mrf.mxu1 }
 0x2bd   : > { %3541 = vmatmul.msk.bf16.gmra.mxu2 %vm2569_vm10, %v4575_v31  ;;  %3562 = vmatmul.msk.bf16.gmra.mxu3 %vm2569_vm10, %v4672_v36 }
 0x2c0   : > { %v4836_v4 = vpop.f32.mrf.mxu3  ;;  %v2714_v33 = vpop.f32.mrf.mxu2 }
 0x2c3   : > { %v2615_v40 = vpop.f32.mrf.mxu0 }
 0x2c4   : > { %v2715_v31 = vadd.f32 %v2714_v33, %v2615_v40  ;;  %v2622_v45 = vpop.f32.mrf.mxu1 }
 0x2c8   : > { %v4838_v52 = vpop.f32.mrf.mxu3  ;;  %v2716_v1 = vpop.f32.mrf.mxu2 }
 0x2cb   : > { %v2617_v32 = vpop.f32.mrf.mxu0 }
 0x2cc   : > { %v2717_v15 = vadd.f32 %v2716_v1, %v2617_v32  ;;  %v2625_v25 = vpop.f32.mrf.mxu1 }
 0x2cd   : > { %3542 = vmatmul.msk.bf16.gmra.mxu2 %vm2569_vm10, %v4672_v36  ;;  %3563 = vmatmul.msk.bf16.gmra.mxu3 %vm2569_vm10, %v4694_v26  ;;  %v4853_v36 = vld [vmem:[%s5209_s7] ss:$0 sm:$0xff] }
 0x2d0   : > { %v2719_v14 = vpop.f32.mrf.mxu2  ;;  %v2816_v0 = vpop.f32.mrf.mxu3 }
 0x2d1   : > { %v2896_v3 = vadd.f32 %v2816_v0, %v2715_v31  ;;  %v2720_v53 = vadd.f32 %v2719_v14, %v2620_v23 }
 0x2d3   : > { %v2932_v48 = vmul.f32 %v4847_v30, %v2896_v3 }
 0x2d4   : > { %v2627_v33 = vpop.f32.mrf.mxu1 }
 0x2d5   : > { %v2968_v43 = vadd.f32 %v4853_v36, %v2932_v48 }
 0x2d7   : > { %v3000_v50 = vmax.f32 %v2968_v43, 0.0 }
 0x2d8   : > { %v2721_v18 = vpop.f32.mrf.mxu2  ;;  %v2818_v62 = vpop.f32.mrf.mxu3 }
 0x2d9   : > { %v2897_v42 = vadd.f32 %v2818_v62, %v2717_v15  ;;  %v2722_v63 = vadd.f32 %v2721_v18, %v2622_v45 }
 0x2db   : > { %v2933_v10 = vmul.f32 %v4847_v30, %v2897_v42 }
 0x2dc   : > { %v2630_v15 = vpop.f32.mrf.mxu1 }
 0x2dd   : > { %v2969_v17 = vadd.f32 %v4853_v36, %v2933_v10  ;;  %3543 = vmatmul.msk.bf16.gmra.mxu2 %vm2569_vm10, %v4694_v26  ;;  %3564 = vmatmul.msk.bf16.gmra.mxu3 %vm2569_vm10, %v4714_v2 }
 0x2df   : > { %v3001_v59 = vmax.f32 %v2969_v17, 0.0 }
 0x2e0   : > { %v2724_v12 = vpop.f32.mrf.mxu2  ;;  %v2821_v20 = vpop.f32.mrf.mxu3 }
 0x2e1   : > { %v3032_v9 = vpack.c.bf16 %v3001_v59, %v3000_v50  ;;  %v2898_v55 = vadd.f32 %v2821_v20, %v2720_v53  ;;  %v2725_v32 = vadd.f32 %v2724_v12, %v2625_v25 }
 0x2e3   : > { %3571 = vmatmul.msk.bf16.vlgmr.msrb.gmra.mxu1 %vm2467_vm8, %v3032_v9  ;;  %v2934_v6 = vmul.f32 %v4847_v30, %v2898_v55 }
 0x2e4   : > { %v2632_v50 = vpop.f32.mrf.mxu1 }
 0x2e5   : > { %v2970_v1 = vadd.f32 %v4853_v36, %v2934_v6 }
 0x2e7   : > { %v3002_v23 = vmax.f32 %v2970_v1, 0.0 }
 0x2e8   : > { %v2726_v19 = vpop.f32.mrf.mxu2  ;;  %v2823_v7 = vpop.f32.mrf.mxu3 }
 0x2e9   : > { %v2899_v26 = vadd.f32 %v2823_v7, %v2722_v63  ;;  %v2727_v18 = vadd.f32 %v2726_v19, %v2627_v33 }
 0x2eb   : > { %v2935_v40 = vmul.f32 %v4847_v30, %v2899_v26 }
 0x2ec   : > { %v2635_v6 = vpop.f32.mrf.mxu1 }
 0x2ed   : > { %v2971_v0 = vadd.f32 %v4853_v36, %v2935_v40  ;;  %3544 = vmatmul.msk.bf16.gmra.mxu2 %vm2569_vm10, %v4714_v2  ;;  %3565 = vmatmul.msk.bf16.gmra.mxu3 %vm2569_vm10, %v4663_v47 }
 0x2ef   : > { %v3003_v14 = vmax.f32 %v2971_v0, 0.0 }
 0x2f0   : > { %v2729_v31 = vpop.f32.mrf.mxu2  ;;  %v2826_v3 = vpop.f32.mrf.mxu3 }
 0x2f1   : > { %v3033_v45 = vpack.c.bf16 %v3003_v14, %v3002_v23  ;;  %v2900_v48 = vadd.f32 %v2826_v3, %v2725_v32  ;;  %v2730_v9 = vadd.f32 %v2729_v31, %v2630_v15 }
 0x2f3   : > { %3572 = vmatmul.msk.bf16.gmra.mxu1 %vm2467_vm8, %v3033_v45  ;;  %v2936_v62 = vmul.f32 %v4847_v30, %v2900_v48 }
 0x2f4   : > { %v2637_v15 = vpop.f32.mrf.mxu1 }
 0x2f5   : > { %v2972_v2 = vadd.f32 %v4853_v36, %v2936_v62 }
 0x2f7   : > { %v3004_v25 = vmax.f32 %v2972_v2, 0.0 }
 0x2f8   : > { %v2731_v42 = vpop.f32.mrf.mxu2  ;;  %v2828_v43 = vpop.f32.mrf.mxu3 }
 0x2f9   : > { %v2901_v10 = vadd.f32 %v2828_v43, %v2727_v18  ;;  %v2732_v19 = vadd.f32 %v2731_v42, %v2632_v50 }
 0x2fb   : > { %v2937_v17 = vmul.f32 %v4847_v30, %v2901_v10 }
 0x2fd   : > { %v2973_v59 = vadd.f32 %v4853_v36, %v2937_v17  ;;  %3545 = vmatmul.msk.bf16.gmra.mxu2 %vm2569_vm10, %v4663_v47  ;;  %3566 = vmatmul.msk.bf16.gmra.mxu3 %vm2569_vm10, %v4681_v34  ;;  %v2640_v17 = vpop.f32.mrf.mxu1 }
 0x2ff   : > { %v3005_v12 = vmax.f32 %v2973_v59, 0.0 }
 0x300   : > { %v2734_v20 = vpop.f32.mrf.mxu2  ;;  %v2831_v53 = vpop.f32.mrf.mxu3 }
 0x301   : > { %v3034_v55 = vpack.c.bf16 %v3005_v12, %v3004_v25  ;;  %v2902_v63 = vadd.f32 %v2831_v53, %v2730_v9  ;;  %v2735_v32 = vadd.f32 %v2734_v20, %v2635_v6  ;;  %v857_v53 = vadd.s32 272, %v4016_v5 }
 0x303   : > { %3573 = vmatmul.msk.bf16.gmra.mxu1 %vm2467_vm8, %v3034_v55  ;;  %v2938_v7 = vmul.f32 %v4847_v30, %v2902_v63  ;;  %v1393_v6 = vand.u32 15, %v857_v53 }
 0x305   : > { %v2974_v47 = vadd.f32 %v4853_v36, %v2938_v7  ;;  %vm1617_vm4 = vcmp.eq.s32.totalorder %v1393_v6, 0 }
 0x307   : > { %v3006_v23 = vmax.f32 %v2974_v47, 0.0 }
 0x308   : > { %v2736_v33 = vpop.f32.mrf.mxu2  ;;  %v2833_v26 = vpop.f32.mrf.mxu3 }
 0x309   : > { %v2903_v1 = vadd.f32 %v2833_v26, %v2732_v19  ;;  %v2737_v18 = vadd.f32 %v2736_v33, %v2637_v15  ;;  %v2642_v19 = vpop.f32.mrf.mxu1 }
 0x30b   : > { %v2939_v40 = vmul.f32 %v4847_v30, %v2903_v1  ;;  %v1657_v1 = vsel %vm1655_vm1, %v1652_v54, %v5318_v57 }
 0x30d   : > { %v2975_v0 = vadd.f32 %v4853_v36, %v2939_v40  ;;  %3546 = vmatmul.msk.bf16.gmra.mxu2 %vm2569_vm10, %v4681_v34  ;;  %3567 = vmatmul.msk.bf16.gmra.mxu3 %vm2569_vm10, %v4697_v27 }
 0x30f   : > { %v3007_v14 = vmax.f32 %v2975_v0, 0.0 }
 0x310   : > { %v2739_v31 = vpop.f32.mrf.mxu2  ;;  %v2836_v3 = vpop.f32.mrf.mxu3 }
 0x311   : > { %v3035_v45 = vpack.c.bf16 %v3007_v14, %v3006_v23  ;;  %v2904_v48 = vadd.f32 %v2836_v3, %v2735_v32  ;;  %v2740_v9 = vadd.f32 %v2739_v31, %v2640_v17  ;;  %v1798_v23 = vsel %vm1617_vm4, 0.0, %v1657_v1 }
 0x312   : > { %v2051_v31 = vpack.c.bf16 %v1798_v23, %v1798_v23 }
 0x313   : > { %3574 = vmatmul.msk.bf16.gmra.mxu1 %vm2467_vm8, %v3035_v45  ;;  %v2940_v62 = vmul.f32 %v4847_v30, %v2904_v48  ;;  %v2340_v48 = vpop.permute.xlu1 %2339 }
 0x314   : > { %v2195_v45 = vunpack.c.l.b16 %v2051_v31 }
 0x315   : > { %v2976_v34 = vadd.f32 %v4853_v36, %v2940_v62 }
 0x317   : > { %v3008_v59 = vmax.f32 %v2976_v34, 0.0 }
 0x318   : > { %v2741_v42 = vpop.f32.mrf.mxu2  ;;  %v2838_v43 = vpop.f32.mrf.mxu3 }
 0x319   : > { %v2905_v10 = vadd.f32 %v2838_v43, %v2737_v18  ;;  %v2742_v7 = vadd.f32 %v2741_v42, %v2642_v19  ;;  %v2214_v18 = vpack.c.b16 %v4725_v37, %v2195_v45 }
 0x31b   : > { %v2941_v2 = vmul.f32 %v4847_v30, %v2905_v10  ;;  %v2521_v43 = vsel %vm2467_vm8, %v2214_v18, %v2340_v48  ;;  %v2466_v10 = vpop.permute.xlu2 %2465  ;;  %v4946_v48 = vld [vmem:[%s5212_s10] ss:$0 sm:$0xff] }
 0x31c   : > { %v2558_v17 = vsel %vm2522_vm9, %v2521_v43, %v2466_v10  ;;  %v3681_v10 = vld [vmem:[%s3975_s26] sm:$0xff] }
 0x31d   : > { %v2977_v50 = vadd.f32 %v4853_v36, %v2941_v2  ;;  %3547 = vmatmul.msk.bf16.gmra.mxu2 %vm2569_vm10, %v4697_v27  ;;  %3568 = vmatmul.msk.bf16.gmra.mxu3 %vm2569_vm10, %v4717_v13 }
 0x31f   : > { %v3009_v25 = vmax.f32 %v2977_v50, 0.0 }
 0x320   : > { %v2744_v12 = vpop.f32.mrf.mxu2  ;;  %v2841_v20 = vpop.f32.mrf.mxu3 }
 0x321   : > { %v3036_v55 = vpack.c.bf16 %v3009_v25, %v3008_v59  ;;  %v2906_v63 = vadd.f32 %v2841_v20, %v2740_v9  ;;  %v2745_v54 = vadd.f32 %v2744_v12, %v4768_v49 }
 0x323   : > { %3575 = vmatmul.msk.bf16.gmra.mxu1 %vm2467_vm8, %v3036_v55  ;;  %v2942_v33 = vmul.f32 %v4847_v30, %v2906_v63 }
 0x325   : > { %v2978_v40 = vadd.f32 %v4853_v36, %v2942_v33 }
 0x327   : > { %v3010_v3 = vmax.f32 %v2978_v40, 0.0 }
 0x328   : > { %v2746_v27 = vpop.f32.mrf.mxu2  ;;  %v2843_v26 = vpop.f32.mrf.mxu3 }
 0x329   : > { %v2907_v47 = vadd.f32 %v2843_v26, %v2742_v7 }
 0x32b   : > { %v2943_v0 = vmul.f32 %v4847_v30, %v2907_v47 }
 0x32d   : > { %v2979_v14 = vadd.f32 %v4853_v36, %v2943_v0  ;;  %3548 = vmatmul.msk.bf16.gmra.mxu2 %vm2569_vm10, %v4717_v13  ;;  %3569 = vmatmul.msk.bf16.gmra.mxu3 %vm2569_vm10, %v4735_v29  ;;  %v2747_v13 = vadd.f32 %v2746_v27, %v4781_v41 }
 0x32f   : > { %v3011_v58 = vmax.f32 %v2979_v14, 0.0 }
 0x330   : > { %v2749_v32 = vpop.f32.mrf.mxu2  ;;  %v2846_v5 = vpop.f32.mrf.mxu3 }
 0x331   : > { %v3037_v57 = vpack.c.bf16 %v3011_v58, %v3010_v3  ;;  %v2908_v15 = vadd.f32 %v2846_v5, %v2745_v54  ;;  %v2750_v12 = vadd.f32 %v2749_v32, %v4783_v44 }
 0x333   : > { %3576 = vmatmul.msk.bf16.gmra.mxu1 %vm2467_vm8, %v3037_v57  ;;  %v2944_v62 = vmul.f32 %v4847_v30, %v2908_v15 }
 0x335   : > { %v2980_v49 = vadd.f32 %v4853_v36, %v2944_v62 }
 0x337   : > { %v3012_v37 = vmax.f32 %v2980_v49, 0.0 }
 0x338   : > { %v2751_v29 = vpop.f32.mrf.mxu2  ;;  %v2848_v42 = vpop.f32.mrf.mxu3 }
 0x339   : > { %v2909_v34 = vadd.f32 %v2848_v42, %v2747_v13  ;;  %v2752_v9 = vadd.f32 %v2751_v29, %v4795_v60 }
 0x33b   : > { %v2945_v2 = vmul.f32 %v4847_v30, %v2909_v34 }
 0x33d   : > { %v2981_v50 = vadd.f32 %v4853_v36, %v2945_v2  ;;  %3570 = vmatmul.msk.bf16.gmra.mxu3 %vm2569_vm10, %v2558_v17 }
 0x33f   : > { %v3013_v41 = vmax.f32 %v2981_v50, 0.0 }
 0x340   : > { %v2754_v59 = vpop.f32.mrf.mxu2  ;;  %v2851_v25 = vpop.f32.mrf.mxu3 }
 0x341   : > { %v3038_v20 = vpack.c.bf16 %v3013_v41, %v3012_v37  ;;  %v2910_v53 = vadd.f32 %v2851_v25, %v2750_v12  ;;  %v2755_v40 = vadd.f32 %v2754_v59, %v4801_v61  ;;  %v4941_v61 = vld [vmem:[%s5211_s9] ss:$0 sm:$0xff] }
 0x343   : > { %3577 = vmatmul.msk.bf16.gmra.mxu1 %vm2467_vm8, %v3038_v20  ;;  %v2946_v55 = vmul.f32 %v4847_v30, %v2910_v53  ;;  %v3682_v53 = vld [vmem:[%s3975_s26 + $0x8] sm:$0xff] }
 0x345   : > { %v2982_v7 = vadd.f32 %v4853_v36, %v2946_v55 }
 0x347   : > { %v3014_v26 = vmax.f32 %v2982_v7, 0.0 }
 0x348   : > { %v2756_v63 = vpop.f32.mrf.mxu2  ;;  %v2853_v6 = vpop.f32.mrf.mxu3 }
 0x349   : > { %v2911_v19 = vadd.f32 %v2853_v6, %v2752_v9  ;;  %v2757_v60 = vadd.f32 %v2756_v63, %v4805_v8 }
 0x34b   : > { %v2947_v33 = vmul.f32 %v4847_v30, %v2911_v19 }
 0x34d   : > { %v2983_v27 = vadd.f32 %v4853_v36, %v2947_v33 }
 0x34f   : > { %v3015_v1 = vmax.f32 %v2983_v27, 0.0 }
 0x350   : > { %v2759_v44 = vpop.f32.mrf.mxu2  ;;  %v2856_v47 = vpop.f32.mrf.mxu3 }
 0x351   : > { %v3039_v0 = vpack.c.bf16 %v3015_v1, %v3014_v26  ;;  %v2912_v23 = vadd.f32 %v2856_v47, %v2755_v40  ;;  %v2760_v18 = vadd.f32 %v2759_v44, %v4812_v46  ;;  %v3683_v40 = vld [vmem:[%s3975_s26 + $0x10] sm:$0xff] }
 0x353   : > { %3578 = vmatmul.msk.bf16.gmra.mxu1 %vm2467_vm8, %v3039_v0  ;;  %v2948_v14 = vmul.f32 %v4847_v30, %v2912_v23 }
 0x355   : > { %v2984_v32 = vadd.f32 %v4853_v36, %v2948_v14 }
 0x357   : > { %v3016_v57 = vmax.f32 %v2984_v32, 0.0 }
 0x358   : > { %v2761_v31 = vpop.f32.mrf.mxu2  ;;  %v2858_v3 = vpop.f32.mrf.mxu3 }
 0x359   : > { %v2913_v58 = vadd.f32 %v2858_v3, %v2757_v60  ;;  %v2762_v49 = vadd.f32 %v2761_v31, %v4816_v51 }
 0x35b   : > { %v2949_v5 = vmul.f32 %v4847_v30, %v2913_v58 }
 0x35d   : > { %v2985_v54 = vadd.f32 %v4853_v36, %v2949_v5 }
 0x35f   : > { %v3017_v45 = vmax.f32 %v2985_v54, 0.0 }
 0x360   : > { %v2764_v8 = vpop.f32.mrf.mxu2  ;;  %v2861_v15 = vpop.f32.mrf.mxu3 }
 0x361   : > { %v3040_v13 = vpack.c.bf16 %v3017_v45, %v3016_v57  ;;  %v3110_v62 = vpop.f32.mrf.mxu1  ;;  %v2914_v42 = vadd.f32 %v2861_v15, %v2760_v18  ;;  %v2765_v33 = vadd.f32 %v2764_v8, %v4824_v21  ;;  %v3684_v45 = vld [vmem:[%s3975_s26 + $0x18] sm:$0xff] }
 0x362   : > { %v3194_v29 = vmul.f32 %v4941_v61, %v3110_v62 }
 0x363   : > { %3579 = vmatmul.msk.bf16.gmra.mxu1 %vm2467_vm8, %v3040_v13  ;;  %v2950_v2 = vmul.f32 %v4847_v30, %v2914_v42 }
 0x364   : > { %v3230_v43 = vadd.f32 %v4946_v48, %v3194_v29 }
 0x365   : > { %v2986_v25 = vadd.f32 %v4853_v36, %v2950_v2 }
 0x366   : > { %v3262_v34 = vadd.f32 %v3681_v10, %v3230_v43 }
 0x367   : > { %v3018_v55 = vmax.f32 %v2986_v25, 0.0 }
 0x368   : > { %v3294_v17 = vmax.f32 %v3262_v34, 0.0  ;;  %v2766_v50 = vpop.f32.mrf.mxu2  ;;  %v2863_v46 = vpop.f32.mrf.mxu3 }
 0x369   : > { %v2915_v37 = vadd.f32 %v2863_v46, %v2762_v49  ;;  %v3112_v41 = vpop.f32.mrf.mxu1  ;;  %v2767_v23 = vadd.f32 %v2766_v50, %v4828_v38 }
 0x36a   : > { %3326 = vst.msk [vmem:[%s4957_s1] sm:$0xff] %vm555_vm0, %v3294_v17  ;;  %v3195_v59 = vmul.f32 %v4941_v61, %v3112_v41  ;;  %v3685_v17 = vld [vmem:[%s3975_s26 + $0x20] sm:$0xff] }
 0x36b   : > { %v2951_v51 = vmul.f32 %v4847_v30, %v2915_v37 }
 0x36c   : > { %v3231_v12 = vadd.f32 %v4946_v48, %v3195_v59 }
 0x36d   : > { %v2987_v20 = vadd.f32 %v4853_v36, %v2951_v51 }
 0x36e   : > { %v3263_v9 = vadd.f32 %v3682_v53, %v3231_v12 }
 0x36f   : > { %v3019_v63 = vmax.f32 %v2987_v20, 0.0 }
 0x370   : > { %v3295_v6 = vmax.f32 %v3263_v9, 0.0  ;;  %v2769_v19 = vpop.f32.mrf.mxu2  ;;  %v2866_v7 = vpop.f32.mrf.mxu3 }
 0x371   : > { %v3041_v27 = vpack.c.bf16 %v3019_v63, %v3018_v55  ;;  %v3115_v26 = vpop.f32.mrf.mxu1  ;;  %v2916_v44 = vadd.f32 %v2866_v7, %v2765_v33  ;;  %v2770_v42 = vadd.f32 %v2769_v19, %v4793_v16  ;;  %v3686_v55 = vld [vmem:[%s3975_s26 + $0x28] sm:$0xff] }
 0x372   : > { %3327 = vst.msk [vmem:[%s4957_s1 + $0x8] sm:$0xff] %vm555_vm0, %v3295_v6  ;;  %v3196_v1 = vmul.f32 %v4941_v61, %v3115_v26 }
 0x373   : > { %3580 = vmatmul.msk.bf16.gmra.mxu1 %vm2467_vm8, %v3041_v27  ;;  %v2952_v60 = vmul.f32 %v4847_v30, %v2916_v44 }
 0x374   : > { %v3232_v47 = vadd.f32 %v4946_v48, %v3196_v1 }
 0x375   : > { %v2988_v5 = vadd.f32 %v4853_v36, %v2952_v60 }
 0x376   : > { %v3264_v0 = vadd.f32 %v3683_v40, %v3232_v47 }
 0x377   : > { %v3020_v15 = vmax.f32 %v2988_v5, 0.0 }
 0x378   : > { %v3296_v21 = vmax.f32 %v3264_v0, 0.0  ;;  %v2771_v14 = vpop.f32.mrf.mxu2  ;;  %v2868_v31 = vpop.f32.mrf.mxu3 }
 0x379   : > { %v2917_v3 = vadd.f32 %v2868_v31, %v2767_v23  ;;  %v3117_v58 = vpop.f32.mrf.mxu1  ;;  %v2772_v46 = vadd.f32 %v2771_v14, %v4797_v28  ;;  %v3687_v23 = vld [vmem:[%s3975_s26 + $0x30] sm:$0xff] }
 0x37a   : > { %3328 = vst.msk [vmem:[%s4957_s1 + $0x10] sm:$0xff] %vm555_vm0, %v3296_v21  ;;  %v3197_v32 = vmul.f32 %v4941_v61, %v3117_v58 }
 0x37b   : > { %v2953_v54 = vmul.f32 %v4847_v30, %v2917_v3 }
 0x37c   : > { %v3233_v57 = vadd.f32 %v4946_v48, %v3197_v32 }
 0x37d   : > { %v2989_v38 = vadd.f32 %v4853_v36, %v2953_v54 }
 0x37e   : > { %v3265_v8 = vadd.f32 %v3684_v45, %v3233_v57  ;;  %v3688_v45 = vld [vmem:[%s3975_s26 + $0x38] sm:$0xff] }
 0x37f   : > { %v3021_v18 = vmax.f32 %v2989_v38, 0.0 }
 0x380   : > { %v3297_v13 = vmax.f32 %v3265_v8, 0.0  ;;  %v2774_v62 = vpop.f32.mrf.mxu2  ;;  %v2871_v29 = vpop.f32.mrf.mxu3 }
 0x381   : > { %v3042_v43 = vpack.c.bf16 %v3021_v18, %v3020_v15  ;;  %v3120_v10 = vpop.f32.mrf.mxu1  ;;  %v2918_v49 = vadd.f32 %v2871_v29, %v2770_v42  ;;  %v2775_v27 = vadd.f32 %v2774_v62, %v4803_v35 }
 0x382   : > { %3329 = vst.msk [vmem:[%s4957_s1 + $0x18] sm:$0xff] %vm555_vm0, %v3297_v13  ;;  %v3198_v34 = vmul.f32 %v4941_v61, %v3120_v10 }
 0x383   : > { %3581 = vmatmul.msk.bf16.gmra.mxu1 %vm2467_vm8, %v3042_v43  ;;  %v2954_v37 = vmul.f32 %v4847_v30, %v2918_v49 }
 0x384   : > { %v3234_v2 = vadd.f32 %v4946_v48, %v3198_v34 }
 0x385   : > { %v2990_v20 = vadd.f32 %v4853_v36, %v2954_v37 }
 0x386   : > { %v3266_v50 = vadd.f32 %v3685_v17, %v3234_v2  ;;  %v3689_v17 = vld [vmem:[%s3975_s26 + $0x40] sm:$0xff] }
 0x387   : > { %v3022_v6 = vmax.f32 %v2990_v20, 0.0 }
 0x388   : > { %v3298_v16 = vmax.f32 %v3266_v50, 0.0  ;;  %v2776_v41 = vpop.f32.mrf.mxu2  ;;  %v2873_v59 = vpop.f32.mrf.mxu3 }
 0x389   : > { %v2919_v25 = vadd.f32 %v2873_v59, %v2772_v46  ;;  %v3122_v51 = vpop.f32.mrf.mxu1  ;;  %v2777_v21 = vadd.f32 %v2776_v41, %v4807_v56 }
 0x38a   : > { %3330 = vst.msk [vmem:[%s4957_s1 + $0x20] sm:$0xff] %vm555_vm0, %v3298_v16  ;;  %v3199_v12 = vmul.f32 %v4941_v61, %v3122_v51 }
 0x38b   : > { %v2955_v53 = vmul.f32 %v4847_v30, %v2919_v25 }
 0x38c   : > { %v3235_v9 = vadd.f32 %v4946_v48, %v3199_v12 }
 0x38d   : > { %v2991_v28 = vadd.f32 %v4853_v36, %v2955_v53 }
 0x38e   : > { %v3267_v63 = vadd.f32 %v3686_v55, %v3235_v9 }
 0x38f   : > { %v3023_v19 = vmax.f32 %v2991_v28, 0.0 }
 0x390   : > { %v3299_v7 = vmax.f32 %v3267_v63, 0.0  ;;  %v2876_v33 = vpop.f32.mrf.mxu3  ;;  %v2779_v44 = vpop.f32.mrf.mxu2 }
 0x391   : > { %v3043_v26 = vpack.c.bf16 %v3023_v19, %v3022_v6  ;;  %v3125_v1 = vpop.f32.mrf.mxu1  ;;  %v2920_v40 = vadd.f32 %v2876_v33, %v2775_v27  ;;  %v2780_v29 = vadd.f32 %v2779_v44, %v4814_v24 }
 0x392   : > { %3331 = vst.msk [vmem:[%s4957_s1 + $0x28] sm:$0xff] %vm555_vm0, %v3299_v7  ;;  %v3200_v47 = vmul.f32 %v4941_v61, %v3125_v1 }
 0x393   : > { %3582 = vmatmul.msk.bf16.gmra.mxu1 %vm2467_vm8, %v3043_v26  ;;  %v2956_v35 = vmul.f32 %v4847_v30, %v2920_v40 }
 0x394   : > { %v3236_v0 = vadd.f32 %v4946_v48, %v3200_v47  ;;  %v3691_v47 = vld [vmem:[%s3975_s26 + $0x50] sm:$0xff] }
 0x395   : > { %v2992_v5 = vadd.f32 %v4853_v36, %v2956_v35 }
 0x396   : > { %v3268_v60 = vadd.f32 %v3687_v23, %v3236_v0 }
 0x397   : > { %v3024_v15 = vmax.f32 %v2992_v5, 0.0  ;;  %v3692_v5 = vld [vmem:[%s3975_s26 + $0x58] sm:$0xff] }
 0x398   : > { %v3300_v14 = vmax.f32 %v3268_v60, 0.0  ;;  %v2878_v31 = vpop.f32.mrf.mxu3  ;;  %v2781_v57 = vpop.f32.mrf.mxu2 }
 0x399   : > { %v2921_v3 = vadd.f32 %v2878_v31, %v2777_v21  ;;  %v3127_v58 = vpop.f32.mrf.mxu1  ;;  %v2782_v46 = vadd.f32 %v2781_v57, %v4818_v39  ;;  %v3690_v39 = vld [vmem:[%s3975_s26 + $0x48] sm:$0xff] }
 0x39a   : > { %3332 = vst.msk [vmem:[%s4957_s1 + $0x30] sm:$0xff] %vm555_vm0, %v3300_v14  ;;  %v3201_v32 = vmul.f32 %v4941_v61, %v3127_v58 }
 0x39b   : > { %v2957_v54 = vmul.f32 %v4847_v30, %v2921_v3 }
 0x39c   : > { %v3237_v38 = vadd.f32 %v4946_v48, %v3201_v32 }
 0x39d   : > { %v2993_v56 = vadd.f32 %v4853_v36, %v2957_v54 }
 0x39e   : > { %v3269_v8 = vadd.f32 %v3688_v45, %v3237_v38 }
 0x39f   : > { %v3025_v18 = vmax.f32 %v2993_v56, 0.0 }
 0x3a0   : > { %v3301_v13 = vmax.f32 %v3269_v8, 0.0  ;;  %v2881_v62 = vpop.f32.mrf.mxu3  ;;  %v2784_v2 = vpop.f32.mrf.mxu2 }
 0x3a1   : > { %v3044_v42 = vpack.c.bf16 %v3025_v18, %v3024_v15  ;;  %v3130_v43 = vpop.f32.mrf.mxu1  ;;  %v2922_v34 = vadd.f32 %v2881_v62, %v2780_v29  ;;  %v2785_v7 = vadd.f32 %v2784_v2, %v4826_v22 }
 0x3a2   : > { %3333 = vst.msk [vmem:[%s4957_s1 + $0x38] sm:$0xff] %vm555_vm0, %v3301_v13  ;;  %v3202_v10 = vmul.f32 %v4941_v61, %v3130_v43  ;;  %v3693_v43 = vld [vmem:[%s3975_s26 + $0x60] sm:$0xff] }
 0x3a3   : > { %3583 = vmatmul.msk.bf16.gmra.mxu1 %vm2467_vm8, %v3044_v42  ;;  %v2958_v24 = vmul.f32 %v4847_v30, %v2922_v34 }
 0x3a4   : > { %v3238_v49 = vadd.f32 %v4946_v48, %v3202_v10 }
 0x3a5   : > { %v2994_v51 = vadd.f32 %v4853_v36, %v2958_v24 }
 0x3a6   : > { %v3270_v50 = vadd.f32 %v3689_v17, %v3238_v49 }
 0x3a7   : > { %v3026_v28 = vmax.f32 %v2994_v51, 0.0 }
 0x3a8   : > { %v3302_v37 = vmax.f32 %v3270_v50, 0.0  ;;  %v2883_v16 = vpop.f32.mrf.mxu3  ;;  %v2786_v63 = vpop.f32.mrf.mxu2 }
 0x3a9   : > { %v2923_v41 = vadd.f32 %v2883_v16, %v2782_v46  ;;  %v3132_v59 = vpop.f32.mrf.mxu1  ;;  %v2787_v0 = vadd.f32 %v2786_v63, %v4830_v11 }
 0x3aa   : > { %3334 = vst.msk [vmem:[%s4957_s1 + $0x40] sm:$0xff] %vm555_vm0, %v3302_v37  ;;  %v3203_v25 = vmul.f32 %v4941_v61, %v3132_v59 }
 0x3ab   : > { %v2959_v12 = vmul.f32 %v4847_v30, %v2923_v41  ;;  %v3694_v41 = vld [vmem:[%s3975_s26 + $0x68] sm:$0xff] }
 0x3ac   : > { %v3239_v20 = vadd.f32 %v4946_v48, %v3203_v25 }
 0x3ad   : > { %v2995_v53 = vadd.f32 %v4853_v36, %v2959_v12 }
 0x3ae   : > { %v3271_v9 = vadd.f32 %v3690_v39, %v3239_v20 }
 0x3af   : > { %v3027_v55 = vmax.f32 %v2995_v53, 0.0 }
 0x3b0   : > { %v3303_v6 = vmax.f32 %v3271_v9, 0.0  ;;  %v2886_v19 = vpop.f32.mrf.mxu3  ;;  %v2789_v14 = vpop.f32.mrf.mxu2 }
 0x3b1   : > { %v3045_v33 = vpack.c.bf16 %v3027_v55, %v3026_v28  ;;  %v3135_v27 = vpop.f32.mrf.mxu1  ;;  %v2924_v1 = vadd.f32 %v2886_v19, %v2785_v7  ;;  %v2790_v8 = vadd.f32 %v2789_v14, %v4836_v4  ;;  %v3696_v19 = vld [vmem:[%s3975_s26 + $0x78] sm:$0xff] }
 0x3b2   : > { %3335 = vst.msk [vmem:[%s4957_s1 + $0x48] sm:$0xff] %vm555_vm0, %v3303_v6  ;;  %v3204_v26 = vmul.f32 %v4941_v61, %v3135_v27 }
 0x3b3   : > { %3584 = vmatmul.msk.bf16.gmra.mxu1 %vm2467_vm8, %v3045_v33  ;;  %v2960_v23 = vmul.f32 %v4847_v30, %v2924_v1 }
 0x3b4   : > { %v3240_v44 = vadd.f32 %v4946_v48, %v3204_v26 }
 0x3b5   : > { %v2996_v3 = vadd.f32 %v4853_v36, %v2960_v23 }
 0x3b6   : > { %v3272_v40 = vadd.f32 %v3691_v47, %v3240_v44  ;;  %v3697_v44 = vld [vmem:[%s3975_s26 + $0x80] sm:$0xff] }
 0x3b7   : > { %v3028_v57 = vmax.f32 %v2996_v3, 0.0 }
 0x3b8   : > { %v3304_v22 = vmax.f32 %v3272_v40, 0.0  ;;  %v2888_v60 = vpop.f32.mrf.mxu3  ;;  %v2791_v29 = vpop.f32.mrf.mxu2 }
 0x3b9   : > { %v2925_v21 = vadd.f32 %v2888_v60, %v2787_v0  ;;  %v3137_v35 = vpop.f32.mrf.mxu1  ;;  %v2792_v34 = vadd.f32 %v2791_v29, %v4838_v52  ;;  %v3698_v60 = vld [vmem:[%s3975_s26 + $0x88] sm:$0xff] }
 0x3ba   : > { %3336 = vst.msk [vmem:[%s4957_s1 + $0x50] sm:$0xff] %vm555_vm0, %v3304_v22  ;;  %v3205_v31 = vmul.f32 %v4941_v61, %v3137_v35 }
 0x3bb   : > { %v2961_v58 = vmul.f32 %v4847_v30, %v2925_v21 }
 0x3bc   : > { %v3241_v32 = vadd.f32 %v4946_v48, %v3205_v31 }
 0x3bd   : > { %v2997_v11 = vadd.f32 %v4853_v36, %v2961_v58  ;;  %v3699_v58 = vld [vmem:[%s3975_s26 + $0x90] sm:$0xff] }
 0x3be   : > { %v3273_v54 = vadd.f32 %v3692_v5, %v3241_v32 }
 0x3bf   : > { %v3029_v38 = vmax.f32 %v2997_v11, 0.0 }
 0x3c0   : > { %v3305_v56 = vmax.f32 %v3273_v54, 0.0  ;;  %v2891_v45 = vpop.f32.mrf.mxu3 }
 0x3c1   : > { %v3046_v15 = vpack.c.bf16 %v3029_v38, %v3028_v57  ;;  %v3140_v18 = vpop.f32.mrf.mxu1  ;;  %v2926_v62 = vadd.f32 %v2891_v45, %v2790_v8  ;;  %v3700_v38 = vld [vmem:[%s3975_s26 + $0x98] sm:$0xff] }
 0x3c2   : > { %3337 = vst.msk [vmem:[%s4957_s1 + $0x58] sm:$0xff] %vm555_vm0, %v3305_v56  ;;  %v3206_v13 = vmul.f32 %v4941_v61, %v3140_v18 }
 0x3c3   : > { %3585 = vmatmul.msk.bf16.gmra.mxu1 %vm2467_vm8, %v3046_v15  ;;  %v2962_v4 = vmul.f32 %v4847_v30, %v2926_v62 }
 0x3c4   : > { %v3242_v42 = vadd.f32 %v4946_v48, %v3206_v13  ;;  %v3701_v13 = vld [vmem:[%s3975_s26 + $0xa0] sm:$0xff] }
 0x3c5   : > { %v2998_v24 = vadd.f32 %v4853_v36, %v2962_v4 }
 0x3c6   : > { %v3274_v10 = vadd.f32 %v3693_v43, %v3242_v42 }
 0x3c7   : > { %v3030_v25 = vmax.f32 %v2998_v24, 0.0 }
 0x3c8   : > { %v3306_v49 = vmax.f32 %v3274_v10, 0.0  ;;  %v2893_v2 = vpop.f32.mrf.mxu3 }
 0x3c9   : > { %v2927_v17 = vadd.f32 %v2893_v2, %v2792_v34  ;;  %v3142_v50 = vpop.f32.mrf.mxu1  ;;  %v3702_v34 = vld [vmem:[%s3975_s26 + $0xa8] sm:$0xff] }
 0x3ca   : > { %3338 = vst.msk [vmem:[%s4957_s1 + $0x60] sm:$0xff] %vm555_vm0, %v3306_v49  ;;  %v3207_v46 = vmul.f32 %v4941_v61, %v3142_v50 }
 0x3cb   : > { %v2963_v37 = vmul.f32 %v4847_v30, %v2927_v17 }
 0x3cc   : > { %v3243_v16 = vadd.f32 %v4946_v48, %v3207_v46  ;;  %v3703_v46 = vld [vmem:[%s3975_s26 + $0xb0] sm:$0xff] }
 0x3cd   : > { %v2999_v52 = vadd.f32 %v4853_v36, %v2963_v37  ;;  %v3695_v36 = vld [vmem:[%s3975_s26 + $0x70] sm:$0xff] }
 0x3ce   : > { %v3275_v59 = vadd.f32 %v3694_v41, %v3243_v16 }
 0x3cf   : > { %v3031_v51 = vmax.f32 %v2999_v52, 0.0 }
 0x3d0   : > { %v3307_v12 = vmax.f32 %v3275_v59, 0.0  ;;  %v3704_v59 = vld [vmem:[%s3975_s26 + $0xb8] sm:$0xff] }
 0x3d1   : > { %v3047_v20 = vpack.c.bf16 %v3031_v51, %v3030_v25  ;;  %v3145_v53 = vpop.f32.mrf.mxu1 }
 0x3d2   : > { %3339 = vst.msk [vmem:[%s4957_s1 + $0x68] sm:$0xff] %vm555_vm0, %v3307_v12  ;;  %v3208_v39 = vmul.f32 %v4941_v61, %v3145_v53 }
 0x3d3   : > { %3586 = vmatmul.msk.bf16.gmra.mxu1 %vm2467_vm8, %v3047_v20 }
 0x3d4   : > { %v3244_v30 = vadd.f32 %v4946_v48, %v3208_v39  ;;  %v3705_v39 = vld [vmem:[%s3975_s26 + $0xc0] sm:$0xff] }
 0x3d6   : > { %v3276_v9 = vadd.f32 %v3695_v36, %v3244_v30 }
 0x3d8   : > { %v3308_v28 = vmax.f32 %v3276_v9, 0.0 }
 0x3d9   : > { %v3147_v55 = vpop.f32.mrf.mxu1 }
 0x3da   : > { %3340 = vst.msk [vmem:[%s4957_s1 + $0x70] sm:$0xff] %vm555_vm0, %v3308_v28  ;;  %v3209_v63 = vmul.f32 %v4941_v61, %v3147_v55 }
 0x3dc   : > { %v3245_v6 = vadd.f32 %v4946_v48, %v3209_v63  ;;  %v3706_v63 = vld [vmem:[%s3975_s26 + $0xc8] sm:$0xff] }
 0x3de   : > { %v3277_v7 = vadd.f32 %v3696_v19, %v3245_v6 }
 0x3e0   : > { %v3309_v33 = vmax.f32 %v3277_v7, 0.0 }
 0x3e1   : > { %v3150_v27 = vpop.f32.mrf.mxu1 }
 0x3e2   : > { %3341 = vst.msk [vmem:[%s4957_s1 + $0x78] sm:$0xff] %vm555_vm0, %v3309_v33  ;;  %v3210_v26 = vmul.f32 %v4941_v61, %v3150_v27 }
 0x3e4   : > { %v3246_v1 = vadd.f32 %v4946_v48, %v3210_v26  ;;  %v3707_v26 = vld [vmem:[%s3975_s26 + $0xd0] sm:$0xff] }
 0x3e6   : > { %v3278_v47 = vadd.f32 %v3697_v44, %v3246_v1 }
 0x3e8   : > { %v3310_v40 = vmax.f32 %v3278_v47, 0.0 }
 0x3e9   : > { %v3152_v0 = vpop.f32.mrf.mxu1 }
 0x3ea   : > { %3342 = vst.msk [vmem:[%s4957_s1 + $0x80] sm:$0xff] %vm555_vm0, %v3310_v40  ;;  %v3211_v23 = vmul.f32 %v4941_v61, %v3152_v0 }
 0x3ec   : > { %v3247_v22 = vadd.f32 %v4946_v48, %v3211_v23  ;;  %v3708_v23 = vld [vmem:[%s3975_s26 + $0xd8] sm:$0xff] }
 0x3ee   : > { %v3279_v21 = vadd.f32 %v3698_v60, %v3247_v22 }
 0x3f0   : > { %v3311_v35 = vmax.f32 %v3279_v21, 0.0 }
 0x3f1   : > { %v3155_v14 = vpop.f32.mrf.mxu1 }
 0x3f2   : > { %3343 = vst.msk [vmem:[%s4957_s1 + $0x88] sm:$0xff] %vm555_vm0, %v3311_v35  ;;  %v3212_v31 = vmul.f32 %v4941_v61, %v3155_v14 }
 0x3f4   : > { %v3248_v3 = vadd.f32 %v4946_v48, %v3212_v31  ;;  %v3709_v31 = vld [vmem:[%s3975_s26 + $0xe0] sm:$0xff] }
 0x3f6   : > { %v3280_v32 = vadd.f32 %v3699_v58, %v3248_v3 }
 0x3f8   : > { %v3312_v11 = vmax.f32 %v3280_v32, 0.0 }
 0x3f9   : > { %v3157_v5 = vpop.f32.mrf.mxu1 }
 0x3fa   : > { %3344 = vst.msk [vmem:[%s4957_s1 + $0x90] sm:$0xff] %vm555_vm0, %v3312_v11  ;;  %v3213_v54 = vmul.f32 %v4941_v61, %v3157_v5 }
 0x3fc   : > { %v3249_v57 = vadd.f32 %v4946_v48, %v3213_v54  ;;  %v3710_v54 = vld [vmem:[%s3975_s26 + $0xe8] sm:$0xff] }
 0x3fe   : > { %v3281_v56 = vadd.f32 %v3700_v38, %v3249_v57 }
 0x400   : > { %v3313_v45 = vmax.f32 %v3281_v56, 0.0 }
 0x401   : > { %v3160_v8 = vpop.f32.mrf.mxu1 }
 0x402   : > { %3345 = vst.msk [vmem:[%s4957_s1 + $0x98] sm:$0xff] %vm555_vm0, %v3313_v45  ;;  %v3214_v15 = vmul.f32 %v4941_v61, %v3160_v8 }
 0x404   : > { %v3250_v18 = vadd.f32 %v4946_v48, %v3214_v15  ;;  %v3711_v15 = vld [vmem:[%s3975_s26 + $0xf0] sm:$0xff] }
 0x406   : > { %v3282_v62 = vadd.f32 %v3701_v13, %v3250_v18 }
 0x408   : > { %v3314_v29 = vmax.f32 %v3282_v62, 0.0 }
 0x409   : > { %v3162_v42 = vpop.f32.mrf.mxu1 }
 0x40a   : > { %3346 = vst.msk [vmem:[%s4957_s1 + $0xa0] sm:$0xff] %vm555_vm0, %v3314_v29  ;;  %v3215_v43 = vmul.f32 %v4941_v61, %v3162_v42 }
 0x40c   : > { %v3251_v10 = vadd.f32 %v4946_v48, %v3215_v43  ;;  %v3712_v43 = vld [vmem:[%s3975_s26 + $0xf8] sm:$0xff] }
 0x40e   : > { %v3283_v4 = vadd.f32 %v3702_v34, %v3251_v10 }
 0x410   : > { %v3315_v49 = vmax.f32 %v3283_v4, 0.0 }
 0x411   : > { %v3165_v2 = vpop.f32.mrf.mxu1 }
 0x412   : > { %3347 = vst.msk [vmem:[%s4957_s1 + $0xa8] sm:$0xff] %vm555_vm0, %v3315_v49  ;;  %v3216_v17 = vmul.f32 %v4941_v61, %v3165_v2 }
 0x414   : > { %v3252_v50 = vadd.f32 %v4946_v48, %v3216_v17 }
 0x416   : > { %v3284_v24 = vadd.f32 %v3703_v46, %v3252_v50 }
 0x418   : > { %v3316_v37 = vmax.f32 %v3284_v24, 0.0 }
 0x419   : > { %v3167_v16 = vpop.f32.mrf.mxu1 }
 0x41a   : > { %3348 = vst.msk [vmem:[%s4957_s1 + $0xb0] sm:$0xff] %vm555_vm0, %v3316_v37  ;;  %v3217_v52 = vmul.f32 %v4941_v61, %v3167_v16 }
 0x41c   : > { %v3253_v41 = vadd.f32 %v4946_v48, %v3217_v52 }
 0x41e   : > { %v3285_v25 = vadd.f32 %v3704_v59, %v3253_v41 }
 0x420   : > { %v3317_v51 = vmax.f32 %v3285_v25, 0.0 }
 0x421   : > { %v3170_v12 = vpop.f32.mrf.mxu1 }
 0x422   : > { %3349 = vst.msk [vmem:[%s4957_s1 + $0xb8] sm:$0xff] %vm555_vm0, %v3317_v51  ;;  %v3218_v20 = vmul.f32 %v4941_v61, %v3170_v12 }
 0x424   : > { %v3254_v53 = vadd.f32 %v4946_v48, %v3218_v20 }
 0x426   : > { %v3286_v30 = vadd.f32 %v3705_v39, %v3254_v53 }
 0x428   : > { %v3318_v36 = vmax.f32 %v3286_v30, 0.0 }
 0x429   : > { %v3172_v9 = vpop.f32.mrf.mxu1 }
 0x42a   : > { %3350 = vst.msk [vmem:[%s4957_s1 + $0xc0] sm:$0xff] %vm555_vm0, %v3318_v36  ;;  %v3219_v28 = vmul.f32 %v4941_v61, %v3172_v9 }
 0x42c   : > { %v3255_v55 = vadd.f32 %v4946_v48, %v3219_v28 }
 0x42e   : > { %v3287_v6 = vadd.f32 %v3706_v63, %v3255_v55 }
 0x430   : > { %v3319_v19 = vmax.f32 %v3287_v6, 0.0 }
 0x431   : > { %v3175_v7 = vpop.f32.mrf.mxu1 }
 0x432   : > { %3351 = vst.msk [vmem:[%s4957_s1 + $0xc8] sm:$0xff] %vm555_vm0, %v3319_v19  ;;  %v3220_v33 = vmul.f32 %v4941_v61, %v3175_v7 }
 0x434   : > { %v3256_v27 = vadd.f32 %v4946_v48, %v3220_v33 }
 0x436   : > { %v3288_v1 = vadd.f32 %v3707_v26, %v3256_v27 }
 0x438   : > { %v3320_v44 = vmax.f32 %v3288_v1, 0.0 }
 0x439   : > { %v3177_v47 = vpop.f32.mrf.mxu1 }
 0x43a   : > { %3352 = vst.msk [vmem:[%s4957_s1 + $0xd0] sm:$0xff] %vm555_vm0, %v3320_v44  ;;  %v3221_v40 = vmul.f32 %v4941_v61, %v3177_v47 }
 0x43c   : > { %v3257_v0 = vadd.f32 %v4946_v48, %v3221_v40 }
 0x43e   : > { %v3289_v22 = vadd.f32 %v3708_v23, %v3257_v0 }
 0x440   : > { %v3321_v60 = vmax.f32 %v3289_v22, 0.0 }
 0x441   : > { %v3180_v21 = vpop.f32.mrf.mxu1 }
 0x442   : > { %3353 = vst.msk [vmem:[%s4957_s1 + $0xd8] sm:$0xff] %vm555_vm0, %v3321_v60  ;;  %v3222_v35 = vmul.f32 %v4941_v61, %v3180_v21 }
 0x444   : > { %v3258_v14 = vadd.f32 %v4946_v48, %v3222_v35 }
 0x446   : > { %v3290_v3 = vadd.f32 %v3709_v31, %v3258_v14 }
 0x448   : > { %v3322_v58 = vmax.f32 %v3290_v3, 0.0 }
 0x449   : > { %v3182_v32 = vpop.f32.mrf.mxu1 }
 0x44a   : > { %3354 = vst.msk [vmem:[%s4957_s1 + $0xe0] sm:$0xff] %vm555_vm0, %v3322_v58  ;;  %v3223_v11 = vmul.f32 %v4941_v61, %v3182_v32 }
 0x44c   : > { %v3259_v5 = vadd.f32 %v4946_v48, %v3223_v11 }
 0x44e   : > { %v3291_v57 = vadd.f32 %v3710_v54, %v3259_v5 }
 0x450   : > { %v3323_v38 = vmax.f32 %v3291_v57, 0.0 }
 0x451   : > { %v3185_v56 = vpop.f32.mrf.mxu1 }
 0x452   : > { %3355 = vst.msk [vmem:[%s4957_s1 + $0xe8] sm:$0xff] %vm555_vm0, %v3323_v38  ;;  %v3224_v45 = vmul.f32 %v4941_v61, %v3185_v56 }
 0x454   : > { %v3260_v8 = vadd.f32 %v4946_v48, %v3224_v45 }
 0x456   : > { %v3292_v18 = vadd.f32 %v3711_v15, %v3260_v8 }
 0x458   : > { %v3324_v13 = vmax.f32 %v3292_v18, 0.0 }
 0x459   : > { %v3187_v62 = vpop.f32.mrf.mxu1 }
 0x45a   : > { %3356 = vst.msk [vmem:[%s4957_s1 + $0xf0] sm:$0xff] %vm555_vm0, %v3324_v13  ;;  %v3225_v29 = vmul.f32 %v4941_v61, %v3187_v62 }
 0x45c   : > { %v3261_v42 = vadd.f32 %v4946_v48, %v3225_v29 }
 0x45e   : > { %v3293_v10 = vadd.f32 %v3712_v43, %v3261_v42 }
 0x460   : > { %v3325_v34 = vmax.f32 %v3293_v10, 0.0 }
 0x462   : > { %3357 = vst.msk [vmem:[%s4957_s1 + $0xf8] sm:$0xff] %vm555_vm0, %v3325_v34 }
 0x463   : > { %3770 = shalt.err (!%p3767_p13)
}
 0x464   : > { %s3834_s20 = smov 128  }
 0x465   : > { %3605 = dma.vmem_to_hbm [thread:$0]  (%p3946_p9), %s3375_s14, 4096, %s3377_s15, %s3359_s19, %s3834_s20, %s3834_s20, %s3832_s13  }
 0x466 PF: > { %s5338_s1 = sld [smem:[#allocation10_spill]]  ;;  %p3612_p0 = pnand %p3480_p12, %p3953_p11 }
 0x468   : > { %p3613_p1 = pneg %p3612_p0 }
 0x46c   : > { %s3391_s28 = sand.u32 1, %s5338_s1  }
 0x46d   : > { %s3392_s12 = scalar_lea.sflag [#allocation6], %s3391_s28 }
 0x46e   : > { %3800 = dma.done.wait (%p3613_p1), %s3392_s12, 4096  }
 0x46f   : > { %3802 = vsyncadd (%p3613_p1), %s3392_s12, 4294963200  ;;  %s27_s21 = sadd.s32 1, %s3825_s21   ;;  %s5339_s29 = sld [smem:[#allocation14_spill]] }
 0x470   : > { %p24_p2 = scmp.ge.s32.totalorder %s27_s21, 4   ;;  %s5340_s19 = sld [smem:[#allocation11_spill]] }
 0x471   : > { %s5341_s20 = sld [smem:[#allocation12_spill]]  ;;  %s5342_s16 = smov %s3809_s17 }
 0x472   : > { %s5343_s17 = smov %s3813_s18  ;;  %26 = sbr.rel (!%p24_p2) target bundleno = 6 (0x6), region = 108 }
 0x475   : > { %s5344_s18 = smov %s5339_s29 }
 0x477   :  { %3398 = vsyncpa [#allocation5], 1 }
 0x478   :  { %3400 = vsyncpa [#allocation5 + $0x1], 1 }
 0x479   :  { %3401 = vsyncpa [#allocation6], 1 }
 0x47a   :  { %3403 = vsyncpa [#allocation6 + $0x1], 1 }
 0x47b   :  { %3404 = vsyncmov [#allocation3] }
 0x47e   :  { %s3405_s30 = vpop.sfrf %3404 }
 0x47f   :  { %p3592_p9 = scmp.ne.s32.totalorder %s3405_s30, 0 }
 0x481   :  { %3409 = shalt.err (%p3592_p9)  }
 0x482   :  { %3411 = vsyncmov [#allocation3 + $0x1] }
 0x485   :  { %s3412_s13 = vpop.sfrf %3411 }
 0x486   :  { %p3593_p11 = scmp.ne.s32.totalorder %s3412_s13, 0 }
 0x488   :  { %3416 = shalt.err (%p3593_p11)  }

</bundles_post_ra>
